<compile_context>
chip_gen: v7x
topology: tpu7x:2x2x1
jax: 0.10.0
libtpu: 0.0.40
codegen_flags: <defaults>
</compile_context>

<pallas_src>
import functools
import math

import jax
import jax.numpy as jnp
from jax.experimental import pallas as pl
from jax.experimental.pallas import tpu as pltpu


def transformer_block_kernel(
    x_ref,                   # (1, S, D)   full sequence (resident per batch element)
    sc1_ref, sh1_ref,        # (1, 1, D)   norm1 scale / shift (precomputed, f32)
    sc2_ref, sh2_ref,        # (1, 1, D)   norm2 scale / shift
    wq_ref, wk_ref, wv_ref,  # (D, D)  bf16 (wq pre-scaled by 1/sqrt(hd))
    bq_ref, bk_ref, bv_ref,  # (1, D)  f32  (bq pre-scaled)
    wo_ref, bo_ref,          # (D, D)  bf16, (1, D) f32
    wup_ref, bup_ref, wgate_ref, bgate_ref,   # (D, 4D) bf16, (1, 4D) f32
    wff2_ref, bff2_ref,      # (4D, D) bf16, (1, D) f32
    out_ref,                 # (1, TQ, D)
    k_scr, v_scr,            # (n_heads, S, hd) bf16 — K/V cache, filled once per batch
    ctx_scr,                 # (TQ, D) bf16 — per-head attention outputs
    *, n_heads, q_tile,
):
    eps = 1e-6
    cdt = wq_ref.dtype                       # matmul compute dtype (bf16)
    S = x_ref.shape[1]
    D = x_ref.shape[2]
    hd = D // n_heads

    sc1 = sc1_ref[0]                         # (1, D)
    sh1 = sh1_ref[0]

    def ada_rmsnorm(xx, sc, sh):
        # f32 norm math; scale/shift broadcast over rows.
        var = jnp.mean(xx * xx, axis=-1, keepdims=True)
        nx = xx * jax.lax.rsqrt(var + eps)
        return nx * (1.0 + sc) + sh

    # ---- K/V projection: once per batch element (first query tile only) ----
    @pl.when(pl.program_id(1) == 0)
    def _():
        xkv = x_ref[0].astype(jnp.float32)                       # (S, D)
        nkv = ada_rmsnorm(xkv, sc1, sh1).astype(cdt)
        k = (jnp.dot(nkv, wk_ref[...], preferred_element_type=jnp.float32)
             + bk_ref[...]).astype(cdt)                          # (S, D) bf16
        v = (jnp.dot(nkv, wv_ref[...], preferred_element_type=jnp.float32)
             + bv_ref[...]).astype(cdt)
        # Head-major cache fill (lane slicing happens once per batch element,
        # not once per query tile).
        for h in range(n_heads):
            sl = slice(h * hd, (h + 1) * hd)
            k_scr[h] = k[:, sl]
            v_scr[h] = v[:, sl]

    # ---- per-query-tile work ----
    q_start = pl.multiple_of(pl.program_id(1) * q_tile, q_tile)
    xq = x_ref[0, pl.ds(q_start, q_tile), :].astype(jnp.float32)  # (TQ, D)
    nq = ada_rmsnorm(xq, sc1, sh1).astype(cdt)
    # 1/sqrt(hd) is folded into wq/bq in the wrapper; cast in the same expression.
    q = (jnp.dot(nq, wq_ref[...], preferred_element_type=jnp.float32)
         + bq_ref[...]).astype(cdt)                               # (TQ, D) bf16

    # TODO(synk): for large n_heads, replace this loop with one head-batched
    # lax.dot_general over a (n_heads, TQ, hd) relayout (pltpu.einshape) to keep
    # MXU passes back-to-back and bound code size / vreg live ranges.
    for h in range(n_heads):
        sl = slice(h * hd, (h + 1) * hd)
        # QK^T: contraction on the last axes (no explicit transpose).
        s = jax.lax.dot_general(
            q[:, sl], k_scr[h],
            dimension_numbers=(((1,), (1,)), ((), ())),
            preferred_element_type=jnp.float32)                   # (TQ, S)
        s = s - jnp.max(s, axis=-1, keepdims=True)
        p = jnp.exp(s)
        p = p * pl.reciprocal(jnp.sum(p, axis=-1, keepdims=True), approx=True)
        ctx_scr[:, sl] = jnp.dot(p.astype(cdt), v_scr[h],
                                 preferred_element_type=jnp.float32).astype(cdt)

    attn = jnp.dot(ctx_scr[...], wo_ref[...],
                   preferred_element_type=jnp.float32) + bo_ref[...]
    x1 = xq + attn                                                # (TQ, D) f32

    # ---- feed-forward branch (SwiGLU), split up/gate matmuls ----
    n2 = ada_rmsnorm(x1, sc2_ref[0], sh2_ref[0]).astype(cdt)
    up = jnp.dot(n2, wup_ref[...], preferred_element_type=jnp.float32) + bup_ref[...]
    gate = jnp.dot(n2, wgate_ref[...], preferred_element_type=jnp.float32) + bgate_ref[...]
    gate = gate * jax.nn.sigmoid(gate)                            # SiLU in f32
    ff = jnp.dot((gate * up).astype(cdt), wff2_ref[...],
                 preferred_element_type=jnp.float32) + bff2_ref[...]   # (TQ, D)

    out_ref[0] = (x1 + ff).astype(out_ref.dtype)


def _vmem_estimate(TQ, S, D, weight_bytes, x_itemsize):
    """Rough per-core VMEM footprint (bytes) for a given query tile."""
    Hff = 4 * D
    est = weight_bytes                       # resident, single-buffered bf16 weights
    est += 2 * S * D * x_itemsize            # double-buffered (1,S,D) input block
    est += 2 * TQ * D * x_itemsize           # double-buffered (1,TQ,D) output block
    est += 2 * (2 * S * D)                   # bf16 K/V caches
    est += 2 * TQ * D                        # bf16 ctx scratch
    est += 4 * (3 * S * D)                   # f32 transients in the K/V fill
    est += 4 * (2 * TQ * S)                  # per-head score / prob f32
    est += 4 * (3 * TQ * Hff)                # up / gate / silu*up f32
    est += 4 * (6 * TQ * D)                  # misc (TQ, D) f32 temporaries
    return est


def _pick_q_tile(S, D, weight_bytes, x_itemsize, budget_bytes):
    # Largest query tile that divides S and fits the VMEM budget; bigger tiles
    # amortize the ~0.35us per-grid-step overhead and feed the MXU a larger M.
    for t in (512, 256, 128):
        if S % t == 0 and _vmem_estimate(t, S, D, weight_bytes, x_itemsize) <= budget_bytes:
            return t
    for t in (128, 256, 512):
        if S % t == 0:
            return t
    return S  # small / irregular S: one full-sequence tile


def transformer_block(x, time_emb, params, n_heads, *, compute_dtype=jnp.bfloat16):
    B, S, D = x.shape
    Hff = 4 * D
    hd = D // n_heads
    f32 = jnp.float32

    (wt1, bt1, wt2, bt2, wqkv, bqkv, wo, bo, wff1, bff1, wff2, bff2) = params

    # ---- hoisted time-conditioning MLPs (tiny M=B matmuls, done once in XLA) ----
    temb = time_emb.astype(f32)
    temb_act = temb * jax.nn.sigmoid(temb)
    ss1 = temb_act @ wt1.astype(f32) + bt1.astype(f32)     # (B, 2D)
    ss2 = temb_act @ wt2.astype(f32) + bt2.astype(f32)
    scale1, shift1 = ss1[:, None, :D], ss1[:, None, D:]    # (B, 1, D) each
    scale2, shift2 = ss2[:, None, :D], ss2[:, None, D:]

    # ---- split fused projections; weights -> bf16, biases stay f32 ----
    cdt = compute_dtype
    sm_scale = 1.0 / math.sqrt(hd)
    wq = (wqkv[:, :D] * sm_scale).astype(cdt)              # fold 1/sqrt(hd) into Wq/bq
    wk = wqkv[:, D:2 * D].astype(cdt)
    wv = wqkv[:, 2 * D:].astype(cdt)
    bq = (bqkv[:, :D] * sm_scale).astype(f32)
    bk = bqkv[:, D:2 * D].astype(f32)
    bv = bqkv[:, 2 * D:].astype(f32)
    wo_c, bo_c = wo.astype(cdt), bo.astype(f32)
    w_up, w_gate = wff1[:, :Hff].astype(cdt), wff1[:, Hff:].astype(cdt)
    b_up, b_gate = bff1[:, :Hff].astype(f32), bff1[:, Hff:].astype(f32)
    wff2_c, bff2_c = wff2.astype(cdt), bff2.astype(f32)

    weights = (wq, wk, wv, bq, bk, bv, wo_c, bo_c,
               w_up, b_up, w_gate, b_gate, wff2_c, bff2_c)
    weight_bytes = sum(int(a.size) * a.dtype.itemsize for a in weights)

    # Per-generation VMEM budget (v5e/v6e: 128 MiB, v7x: 64 MiB per TC).
    phys_vmem = 64 << 20
    try:
        phys_vmem = int(pltpu.get_tpu_info().vmem_capacity_bytes)
    except Exception:
        pass

    x_itemsize = x.dtype.itemsize
    TQ = _pick_q_tile(S, D, weight_bytes, x_itemsize, int(phys_vmem * 0.85))
    NQ = max(S // TQ, 1)

    est = _vmem_estimate(TQ, S, D, weight_bytes, x_itemsize)
    vmem_limit = int(max(32 << 20, min(int(est * 1.25), phys_vmem - (4 << 20))))

    # TODO(synk): for v7x (64 MiB VMEM) with D >= ~1024, stream W_up/W_gate/W_ff2
    # along the hidden dim (extra grid axis + f32 accumulator) instead of keeping
    # the FF weights fully resident; only the attention weights stay pinned.
    # TODO(synk): optional int8 (v5e/v6e) / fp8 (v7x) FF-weight quantization to
    # halve the resident weight bytes and the one-time weight DMA.

    kernel = functools.partial(transformer_block_kernel, n_heads=n_heads, q_tile=TQ)

    # Untiled, single-buffered resident VMEM specs for weights (no pipelining).
    vmem_spec = pl.BlockSpec(memory_space=pltpu.MemorySpace.VMEM)

    in_specs = [
        pl.BlockSpec((1, S, D), lambda b, s: (b, 0, 0)),   # full sequence (resident / b)
        pl.BlockSpec((1, 1, D), lambda b, s: (b, 0, 0)),   # scale1
        pl.BlockSpec((1, 1, D), lambda b, s: (b, 0, 0)),   # shift1
        pl.BlockSpec((1, 1, D), lambda b, s: (b, 0, 0)),   # scale2
        pl.BlockSpec((1, 1, D), lambda b, s: (b, 0, 0)),   # shift2
    ] + [vmem_spec] * len(weights)

    out_specs = pl.BlockSpec((1, TQ, D), lambda b, s: (b, s, 0))
    scratch_shapes = [
        pltpu.VMEM((n_heads, S, hd), cdt),   # K cache (head-major)
        pltpu.VMEM((n_heads, S, hd), cdt),   # V cache (head-major)
        pltpu.VMEM((TQ, D), cdt),            # per-head attention outputs
    ]

    return pl.pallas_call(
        kernel,
        out_shape=jax.ShapeDtypeStruct((B, S, D), x.dtype),
        grid=(B, NQ),
        in_specs=in_specs,
        out_specs=out_specs,
        scratch_shapes=scratch_shapes,
        compiler_params=pltpu.CompilerParams(
            # Sequence axis must be sequential ("arbitrary"): the K/V scratch is a
            # carry across query tiles of the same batch element.  Batch axis can
            # still shard across TensorCores.
            dimension_semantics=("parallel", "arbitrary"),
            vmem_limit_bytes=vmem_limit,
        ),
    )(x, scale1, shift1, scale2, shift2, *weights)


def reference_transformer_block(x, time_emb, params, n_heads):
    """Plain-JAX f32 reference mirroring the PyTorch forward (eval mode)."""
    (wt1, bt1, wt2, bt2, wqkv, bqkv, wo, bo, wff1, bff1, wff2, bff2) = params
    B, S, D = x.shape
    hd = D // n_heads

    def silu(v):
        return v * jax.nn.sigmoid(v)

    def ada(xx, wt, bt):
        ss = silu(time_emb) @ wt + bt           # (B, 2D)
        ss = ss[:, None, :]                     # (B, 1, 2D)
        scale, shift = ss[..., :D], ss[..., D:]
        var = jnp.mean(xx * xx, axis=-1, keepdims=True)
        nx = xx * jax.lax.rsqrt(var + 1e-6)
        return nx * (1.0 + scale) + shift

    normed = ada(x, wt1, bt1)
    qkv = normed @ wqkv + bqkv
    q, k, v = qkv[..., :D], qkv[..., D:2 * D], qkv[..., 2 * D:]

    def split_heads(t):
        return t.reshape(B, S, n_heads, hd).transpose(0, 2, 1, 3)

    qh, kh, vh = split_heads(q), split_heads(k), split_heads(v)
    s = jnp.einsum("bhqd,bhkd->bhqk", qh, kh) / math.sqrt(hd)
    p = jax.nn.softmax(s, axis=-1)
    o = jnp.einsum("bhqk,bhkd->bhqd", p, vh).transpose(0, 2, 1, 3).reshape(B, S, D)
    attn = o @ wo + bo
    x1 = x + attn

    normed2 = ada(x1, wt2, bt2)
    ff = normed2 @ wff1 + bff1
    hidden = 4 * D
    a, gate = ff[..., :hidden], ff[..., hidden:]
    ff = silu(gate) * a
    ff = ff @ wff2 + bff2
    return x1 + ff


if __name__ == "__main__":
    # Small shapes consistent with the module.
    B, S, D = 2, 8, 32
    n_heads = 4
    T = 16            # time_emb_dim
    hidden = 4 * D    # 128

    key = jax.random.PRNGKey(0)
    ks = jax.random.split(key, 16)
    f32 = jnp.float32

    x = jax.random.normal(ks[0], (B, S, D), dtype=f32)
    time_emb = jax.random.normal(ks[1], (B, T), dtype=f32)

    def init(k, shape, scale=0.05):
        return (scale * jax.random.normal(k, shape)).astype(f32)

    params = (
        init(ks[2], (T, 2 * D)),        init(ks[3], (1, 2 * D)),       # norm1 time MLP
        init(ks[4], (T, 2 * D)),        init(ks[5], (1, 2 * D)),       # norm2 time MLP
        init(ks[6], (D, 3 * D)),        init(ks[7], (1, 3 * D)),       # attn in-proj
        init(ks[8], (D, D)),            init(ks[9], (1, D)),           # attn out-proj
        init(ks[10], (D, 2 * hidden)),  init(ks[11], (1, 2 * hidden)), # ff linear 1
        init(ks[12], (hidden, D)),      init(ks[13], (1, D)),          # ff linear 2
    )

    out = transformer_block(x, time_emb, params, n_heads, compute_dtype=jnp.bfloat16)
    out = jax.block_until_ready(out)

    ref = reference_transformer_block(x, time_emb, params, n_heads)
    assert out.shape == (B, S, D)
    # bf16 matmul operands with f32 accumulation -> loosened tolerance vs f32 ref.
    assert jnp.allclose(out, ref, rtol=2e-2, atol=2e-2), "mismatch vs JAX reference"

    print("KERNEL_OK")
</pallas_src>

<mosaic_0001>
module attributes {stable_mosaic.version = 11 : i64} {
  func.func @transformer_block_kernel(%arg0: i32, %arg1: i32, %arg2: memref<1x8x32xf32, #tpu.memory_space<vmem>>, %arg3: memref<1x1x32xf32, #tpu.memory_space<vmem>>, %arg4: memref<1x1x32xf32, #tpu.memory_space<vmem>>, %arg5: memref<1x1x32xf32, #tpu.memory_space<vmem>>, %arg6: memref<1x1x32xf32, #tpu.memory_space<vmem>>, %arg7: memref<32x32xbf16, #tpu.memory_space<vmem>>, %arg8: memref<32x32xbf16, #tpu.memory_space<vmem>>, %arg9: memref<32x32xbf16, #tpu.memory_space<vmem>>, %arg10: memref<1x32xf32, #tpu.memory_space<vmem>>, %arg11: memref<1x32xf32, #tpu.memory_space<vmem>>, %arg12: memref<1x32xf32, #tpu.memory_space<vmem>>, %arg13: memref<32x32xbf16, #tpu.memory_space<vmem>>, %arg14: memref<1x32xf32, #tpu.memory_space<vmem>>, %arg15: memref<32x128xbf16, #tpu.memory_space<vmem>>, %arg16: memref<1x128xf32, #tpu.memory_space<vmem>>, %arg17: memref<32x128xbf16, #tpu.memory_space<vmem>>, %arg18: memref<1x128xf32, #tpu.memory_space<vmem>>, %arg19: memref<128x32xbf16, #tpu.memory_space<vmem>>, %arg20: memref<1x32xf32, #tpu.memory_space<vmem>>, %arg21: memref<1x8x32xf32, #tpu.memory_space<vmem>>, %arg22: memref<4x8x8xbf16, #tpu.memory_space<vmem>>, %arg23: memref<4x8x8xbf16, #tpu.memory_space<vmem>>, %arg24: memref<8x32xbf16, #tpu.memory_space<vmem>>) attributes {dimension_semantics = [#tpu.dimension_semantics<parallel>, #tpu.dimension_semantics<arbitrary>], iteration_bounds = array<i64: 2, 1>, scalar_prefetch = 0 : i64, scratch_operands = 3 : i64, tpu.core_type = #tpu.core_type<tc>, window_params = [{transform_indices = @transform_0, window_bounds = array<i64: 1, 8, 32>}, {transform_indices = @transform_1, window_bounds = array<i64: 1, 1, 32>}, {transform_indices = @transform_2, window_bounds = array<i64: 1, 1, 32>}, {transform_indices = @transform_3, window_bounds = array<i64: 1, 1, 32>}, {transform_indices = @transform_4, window_bounds = array<i64: 1, 1, 32>}, {pipeline_mode = #tpu.pipeline_mode<synchronous>, transform_indices = @transform_5, window_bounds = array<i64: 32, 32>}, {pipeline_mode = #tpu.pipeline_mode<synchronous>, transform_indices = @transform_6, window_bounds = array<i64: 32, 32>}, {pipeline_mode = #tpu.pipeline_mode<synchronous>, transform_indices = @transform_7, window_bounds = array<i64: 32, 32>}, {pipeline_mode = #tpu.pipeline_mode<synchronous>, transform_indices = @transform_8, window_bounds = array<i64: 1, 32>}, {pipeline_mode = #tpu.pipeline_mode<synchronous>, transform_indices = @transform_9, window_bounds = array<i64: 1, 32>}, {pipeline_mode = #tpu.pipeline_mode<synchronous>, transform_indices = @transform_10, window_bounds = array<i64: 1, 32>}, {pipeline_mode = #tpu.pipeline_mode<synchronous>, transform_indices = @transform_11, window_bounds = array<i64: 32, 32>}, {pipeline_mode = #tpu.pipeline_mode<synchronous>, transform_indices = @transform_12, window_bounds = array<i64: 1, 32>}, {pipeline_mode = #tpu.pipeline_mode<synchronous>, transform_indices = @transform_13, window_bounds = array<i64: 32, 128>}, {pipeline_mode = #tpu.pipeline_mode<synchronous>, transform_indices = @transform_14, window_bounds = array<i64: 1, 128>}, {pipeline_mode = #tpu.pipeline_mode<synchronous>, transform_indices = @transform_15, window_bounds = array<i64: 32, 128>}, {pipeline_mode = #tpu.pipeline_mode<synchronous>, transform_indices = @transform_16, window_bounds = array<i64: 1, 128>}, {pipeline_mode = #tpu.pipeline_mode<synchronous>, transform_indices = @transform_17, window_bounds = array<i64: 128, 32>}, {pipeline_mode = #tpu.pipeline_mode<synchronous>, transform_indices = @transform_18, window_bounds = array<i64: 1, 32>}, {transform_indices = @transform_19, window_bounds = array<i64: 1, 8, 32>}]} {
    %c0 = arith.constant 0 : index
    %c0_0 = arith.constant 0 : index
    %c0_1 = arith.constant 0 : index
    %0 = vector.load %arg3[%c0, %c0_0, %c0_1] : memref<1x1x32xf32, #tpu.memory_space<vmem>>, vector<1x1x32xf32>
    %1 = vector.shape_cast %0 : vector<1x1x32xf32> to vector<1x32xf32>
    %c0_2 = arith.constant 0 : index
    %c0_3 = arith.constant 0 : index
    %c0_4 = arith.constant 0 : index
    %2 = vector.load %arg4[%c0_2, %c0_3, %c0_4] : memref<1x1x32xf32, #tpu.memory_space<vmem>>, vector<1x1x32xf32>
    %3 = vector.shape_cast %2 : vector<1x1x32xf32> to vector<1x32xf32>
    %c0_i32 = arith.constant 0 : i32
    %4 = arith.cmpi eq, %arg1, %c0_i32 : i32
    %5 = arith.extui %4 : i1 to i32
    %c0_i32_5 = arith.constant 0 : i32
    %6 = arith.cmpi ne, %5, %c0_i32_5 : i32
    scf.if %6 {
      %c0_94 = arith.constant 0 : index
      %c0_95 = arith.constant 0 : index
      %c0_96 = arith.constant 0 : index
      %170 = vector.load %arg2[%c0_94, %c0_95, %c0_96] : memref<1x8x32xf32, #tpu.memory_space<vmem>>, vector<1x8x32xf32>
      %171 = vector.shape_cast %170 : vector<1x8x32xf32> to vector<8x32xf32>
      %172 = arith.mulf %171, %171 : vector<8x32xf32>
      %cst_97 = arith.constant dense<0.000000e+00> : vector<8xf32>
      %173 = vector.multi_reduction <add>, %172, %cst_97 [1] : vector<8x32xf32> to vector<8xf32>
      %174 = vector.shape_cast %173 : vector<8xf32> to vector<8x1xf32>
      %cst_98 = arith.constant 3.200000e+01 : f32
      %175 = vector.broadcast %cst_98 : f32 to vector<8x1xf32>
      %176 = arith.divf %174, %175 : vector<8x1xf32>
      %cst_99 = arith.constant 9.99999997E-7 : f32
      %177 = vector.broadcast %cst_99 : f32 to vector<8x1xf32>
      %178 = arith.addf %176, %177 : vector<8x1xf32>
      %179 = math.rsqrt %178 : vector<8x1xf32>
      %180 = vector.broadcast %179 : vector<8x1xf32> to vector<8x32xf32>
      %181 = arith.mulf %171, %180 : vector<8x32xf32>
      %cst_100 = arith.constant 1.000000e+00 : f32
      %182 = vector.broadcast %cst_100 : f32 to vector<1x32xf32>
      %183 = arith.addf %182, %1 : vector<1x32xf32>
      %184 = vector.broadcast %183 : vector<1x32xf32> to vector<8x32xf32>
      %185 = arith.mulf %181, %184 : vector<8x32xf32>
      %186 = vector.broadcast %3 : vector<1x32xf32> to vector<8x32xf32>
      %187 = arith.addf %185, %186 : vector<8x32xf32>
      %188 = arith.truncf %187 : vector<8x32xf32> to vector<8x32xbf16>
      %c0_101 = arith.constant 0 : index
      %c0_102 = arith.constant 0 : index
      %189 = vector.load %arg8[%c0_101, %c0_102] : memref<32x32xbf16, #tpu.memory_space<vmem>>, vector<32x32xbf16>
      %cst_103 = arith.constant dense<0.000000e+00> : vector<8x32xf32>
      %190 = tpu.matmul %188, %189, %cst_103 {dimension_numbers = #tpu.dot_dimension_numbers<[1], [0], [0], [1], [0, 0, 1, 1], [], []>} : vector<8x32xbf16>, vector<32x32xbf16>, vector<8x32xf32> -> vector<8x32xf32>
      %c0_104 = arith.constant 0 : index
      %c0_105 = arith.constant 0 : index
      %191 = vector.load %arg11[%c0_104, %c0_105] : memref<1x32xf32, #tpu.memory_space<vmem>>, vector<1x32xf32>
      %192 = vector.broadcast %191 : vector<1x32xf32> to vector<8x32xf32>
      %193 = arith.addf %190, %192 : vector<8x32xf32>
      %194 = arith.truncf %193 : vector<8x32xf32> to vector<8x32xbf16>
      %c0_106 = arith.constant 0 : index
      %c0_107 = arith.constant 0 : index
      %195 = vector.load %arg9[%c0_106, %c0_107] : memref<32x32xbf16, #tpu.memory_space<vmem>>, vector<32x32xbf16>
      %cst_108 = arith.constant dense<0.000000e+00> : vector<8x32xf32>
      %196 = tpu.matmul %188, %195, %cst_108 {dimension_numbers = #tpu.dot_dimension_numbers<[1], [0], [0], [1], [0, 0, 1, 1], [], []>} : vector<8x32xbf16>, vector<32x32xbf16>, vector<8x32xf32> -> vector<8x32xf32>
      %c0_109 = arith.constant 0 : index
      %c0_110 = arith.constant 0 : index
      %197 = vector.load %arg12[%c0_109, %c0_110] : memref<1x32xf32, #tpu.memory_space<vmem>>, vector<1x32xf32>
      %198 = vector.broadcast %197 : vector<1x32xf32> to vector<8x32xf32>
      %199 = arith.addf %196, %198 : vector<8x32xf32>
      %200 = arith.truncf %199 : vector<8x32xf32> to vector<8x32xbf16>
      %201 = vector.extract_strided_slice %194 {offsets = [0, 0], sizes = [8, 8], strides = [1, 1]} : vector<8x32xbf16> to vector<8x8xbf16>
      %c0_111 = arith.constant 0 : index
      %c0_112 = arith.constant 0 : index
      %c0_113 = arith.constant 0 : index
      %202 = vector.load %arg22[%c0_111, %c0_112, %c0_113] : memref<4x8x8xbf16, #tpu.memory_space<vmem>>, vector<1x8x8xbf16>
      %203 = vector.shape_cast %202 : vector<1x8x8xbf16> to vector<8x8xbf16>
      %204 = vector.shape_cast %201 : vector<8x8xbf16> to vector<1x8x8xbf16>
      tpu.vector_store %arg22[%c0_111, %c0_112, %c0_113], %204 {strides = array<i32>} : memref<4x8x8xbf16, #tpu.memory_space<vmem>>, vector<1x8x8xbf16>,
      %205 = vector.extract_strided_slice %200 {offsets = [0, 0], sizes = [8, 8], strides = [1, 1]} : vector<8x32xbf16> to vector<8x8xbf16>
      %c0_114 = arith.constant 0 : index
      %c0_115 = arith.constant 0 : index
      %c0_116 = arith.constant 0 : index
      %206 = vector.load %arg23[%c0_114, %c0_115, %c0_116] : memref<4x8x8xbf16, #tpu.memory_space<vmem>>, vector<1x8x8xbf16>
      %207 = vector.shape_cast %206 : vector<1x8x8xbf16> to vector<8x8xbf16>
      %208 = vector.shape_cast %205 : vector<8x8xbf16> to vector<1x8x8xbf16>
      tpu.vector_store %arg23[%c0_114, %c0_115, %c0_116], %208 {strides = array<i32>} : memref<4x8x8xbf16, #tpu.memory_space<vmem>>, vector<1x8x8xbf16>,
      %209 = vector.extract_strided_slice %194 {offsets = [0, 8], sizes = [8, 8], strides = [1, 1]} : vector<8x32xbf16> to vector<8x8xbf16>
      %c1_117 = arith.constant 1 : index
      %c0_118 = arith.constant 0 : index
      %c0_119 = arith.constant 0 : index
      %210 = vector.load %arg22[%c1_117, %c0_118, %c0_119] : memref<4x8x8xbf16, #tpu.memory_space<vmem>>, vector<1x8x8xbf16>
      %211 = vector.shape_cast %210 : vector<1x8x8xbf16> to vector<8x8xbf16>
      %212 = vector.shape_cast %209 : vector<8x8xbf16> to vector<1x8x8xbf16>
      tpu.vector_store %arg22[%c1_117, %c0_118, %c0_119], %212 {strides = array<i32>} : memref<4x8x8xbf16, #tpu.memory_space<vmem>>, vector<1x8x8xbf16>,
      %213 = vector.extract_strided_slice %200 {offsets = [0, 8], sizes = [8, 8], strides = [1, 1]} : vector<8x32xbf16> to vector<8x8xbf16>
      %c1_120 = arith.constant 1 : index
      %c0_121 = arith.constant 0 : index
      %c0_122 = arith.constant 0 : index
      %214 = vector.load %arg23[%c1_120, %c0_121, %c0_122] : memref<4x8x8xbf16, #tpu.memory_space<vmem>>, vector<1x8x8xbf16>
      %215 = vector.shape_cast %214 : vector<1x8x8xbf16> to vector<8x8xbf16>
      %216 = vector.shape_cast %213 : vector<8x8xbf16> to vector<1x8x8xbf16>
      tpu.vector_store %arg23[%c1_120, %c0_121, %c0_122], %216 {strides = array<i32>} : memref<4x8x8xbf16, #tpu.memory_space<vmem>>, vector<1x8x8xbf16>,
      %217 = vector.extract_strided_slice %194 {offsets = [0, 16], sizes = [8, 8], strides = [1, 1]} : vector<8x32xbf16> to vector<8x8xbf16>
      %c2_123 = arith.constant 2 : index
      %c0_124 = arith.constant 0 : index
      %c0_125 = arith.constant 0 : index
      %218 = vector.load %arg22[%c2_123, %c0_124, %c0_125] : memref<4x8x8xbf16, #tpu.memory_space<vmem>>, vector<1x8x8xbf16>
      %219 = vector.shape_cast %218 : vector<1x8x8xbf16> to vector<8x8xbf16>
      %220 = vector.shape_cast %217 : vector<8x8xbf16> to vector<1x8x8xbf16>
      tpu.vector_store %arg22[%c2_123, %c0_124, %c0_125], %220 {strides = array<i32>} : memref<4x8x8xbf16, #tpu.memory_space<vmem>>, vector<1x8x8xbf16>,
      %221 = vector.extract_strided_slice %200 {offsets = [0, 16], sizes = [8, 8], strides = [1, 1]} : vector<8x32xbf16> to vector<8x8xbf16>
      %c2_126 = arith.constant 2 : index
      %c0_127 = arith.constant 0 : index
      %c0_128 = arith.constant 0 : index
      %222 = vector.load %arg23[%c2_126, %c0_127, %c0_128] : memref<4x8x8xbf16, #tpu.memory_space<vmem>>, vector<1x8x8xbf16>
      %223 = vector.shape_cast %222 : vector<1x8x8xbf16> to vector<8x8xbf16>
      %224 = vector.shape_cast %221 : vector<8x8xbf16> to vector<1x8x8xbf16>
      tpu.vector_store %arg23[%c2_126, %c0_127, %c0_128], %224 {strides = array<i32>} : memref<4x8x8xbf16, #tpu.memory_space<vmem>>, vector<1x8x8xbf16>,
      %225 = vector.extract_strided_slice %194 {offsets = [0, 24], sizes = [8, 8], strides = [1, 1]} : vector<8x32xbf16> to vector<8x8xbf16>
      %c3_129 = arith.constant 3 : index
      %c0_130 = arith.constant 0 : index
      %c0_131 = arith.constant 0 : index
      %226 = vector.load %arg22[%c3_129, %c0_130, %c0_131] : memref<4x8x8xbf16, #tpu.memory_space<vmem>>, vector<1x8x8xbf16>
      %227 = vector.shape_cast %226 : vector<1x8x8xbf16> to vector<8x8xbf16>
      %228 = vector.shape_cast %225 : vector<8x8xbf16> to vector<1x8x8xbf16>
      tpu.vector_store %arg22[%c3_129, %c0_130, %c0_131], %228 {strides = array<i32>} : memref<4x8x8xbf16, #tpu.memory_space<vmem>>, vector<1x8x8xbf16>,
      %229 = vector.extract_strided_slice %200 {offsets = [0, 24], sizes = [8, 8], strides = [1, 1]} : vector<8x32xbf16> to vector<8x8xbf16>
      %c3_132 = arith.constant 3 : index
      %c0_133 = arith.constant 0 : index
      %c0_134 = arith.constant 0 : index
      %230 = vector.load %arg23[%c3_132, %c0_133, %c0_134] : memref<4x8x8xbf16, #tpu.memory_space<vmem>>, vector<1x8x8xbf16>
      %231 = vector.shape_cast %230 : vector<1x8x8xbf16> to vector<8x8xbf16>
      %232 = vector.shape_cast %229 : vector<8x8xbf16> to vector<1x8x8xbf16>
      tpu.vector_store %arg23[%c3_132, %c0_133, %c0_134], %232 {strides = array<i32>} : memref<4x8x8xbf16, #tpu.memory_space<vmem>>, vector<1x8x8xbf16>,
    } else {
    }
    %c8_i32 = arith.constant 8 : i32
    %7 = arith.muli %arg1, %c8_i32 : i32
    %8 = tpu.assume_multiple %7, 8 : i32
    %c0_6 = arith.constant 0 : index
    %9 = arith.index_cast %8 : i32 to index
    %c0_7 = arith.constant 0 : index
    %10 = vector.load %arg2[%c0_6, %9, %c0_7] : memref<1x8x32xf32, #tpu.memory_space<vmem>>, vector<1x8x32xf32>
    %11 = vector.shape_cast %10 : vector<1x8x32xf32> to vector<8x32xf32>
    %12 = arith.mulf %11, %11 : vector<8x32xf32>
    %cst = arith.constant dense<0.000000e+00> : vector<8xf32>
    %13 = vector.multi_reduction <add>, %12, %cst [1] : vector<8x32xf32> to vector<8xf32>
    %14 = vector.shape_cast %13 : vector<8xf32> to vector<8x1xf32>
    %cst_8 = arith.constant 3.200000e+01 : f32
    %15 = vector.broadcast %cst_8 : f32 to vector<8x1xf32>
    %16 = arith.divf %14, %15 : vector<8x1xf32>
    %cst_9 = arith.constant 9.99999997E-7 : f32
    %17 = vector.broadcast %cst_9 : f32 to vector<8x1xf32>
    %18 = arith.addf %16, %17 : vector<8x1xf32>
    %19 = math.rsqrt %18 : vector<8x1xf32>
    %20 = vector.broadcast %19 : vector<8x1xf32> to vector<8x32xf32>
    %21 = arith.mulf %11, %20 : vector<8x32xf32>
    %cst_10 = arith.constant 1.000000e+00 : f32
    %22 = vector.broadcast %cst_10 : f32 to vector<1x32xf32>
    %23 = arith.addf %22, %1 : vector<1x32xf32>
    %24 = vector.broadcast %23 : vector<1x32xf32> to vector<8x32xf32>
    %25 = arith.mulf %21, %24 : vector<8x32xf32>
    %26 = vector.broadcast %3 : vector<1x32xf32> to vector<8x32xf32>
    %27 = arith.addf %25, %26 : vector<8x32xf32>
    %28 = arith.truncf %27 : vector<8x32xf32> to vector<8x32xbf16>
    %c0_11 = arith.constant 0 : index
    %c0_12 = arith.constant 0 : index
    %29 = vector.load %arg7[%c0_11, %c0_12] : memref<32x32xbf16, #tpu.memory_space<vmem>>, vector<32x32xbf16>
    %cst_13 = arith.constant dense<0.000000e+00> : vector<8x32xf32>
    %30 = tpu.matmul %28, %29, %cst_13 {dimension_numbers = #tpu.dot_dimension_numbers<[1], [0], [0], [1], [0, 0, 1, 1], [], []>} : vector<8x32xbf16>, vector<32x32xbf16>, vector<8x32xf32> -> vector<8x32xf32>
    %c0_14 = arith.constant 0 : index
    %c0_15 = arith.constant 0 : index
    %31 = vector.load %arg10[%c0_14, %c0_15] : memref<1x32xf32, #tpu.memory_space<vmem>>, vector<1x32xf32>
    %32 = vector.broadcast %31 : vector<1x32xf32> to vector<8x32xf32>
    %33 = arith.addf %30, %32 : vector<8x32xf32>
    %34 = arith.truncf %33 : vector<8x32xf32> to vector<8x32xbf16>
    %35 = vector.extract_strided_slice %34 {offsets = [0, 0], sizes = [8, 8], strides = [1, 1]} : vector<8x32xbf16> to vector<8x8xbf16>
    %c0_16 = arith.constant 0 : index
    %c0_17 = arith.constant 0 : index
    %c0_18 = arith.constant 0 : index
    %36 = vector.load %arg22[%c0_16, %c0_17, %c0_18] : memref<4x8x8xbf16, #tpu.memory_space<vmem>>, vector<1x8x8xbf16>
    %37 = vector.shape_cast %36 : vector<1x8x8xbf16> to vector<8x8xbf16>
    %cst_19 = arith.constant dense<0.000000e+00> : vector<8x8xf32>
    %38 = tpu.matmul %35, %37, %cst_19 {dimension_numbers = #tpu.dot_dimension_numbers<[1], [1], [0], [0], [0, 0, 1, 0], [], []>} : vector<8x8xbf16>, vector<8x8xbf16>, vector<8x8xf32> -> vector<8x8xf32>
    %cst_20 = arith.constant dense<0xFF800000> : vector<8xf32>
    %39 = vector.multi_reduction <maximumf>, %38, %cst_20 [1] : vector<8x8xf32> to vector<8xf32>
    %40 = vector.shape_cast %39 : vector<8xf32> to vector<8x1xf32>
    %41 = vector.broadcast %40 : vector<8x1xf32> to vector<8x8xf32>
    %42 = arith.subf %38, %41 : vector<8x8xf32>
    %43 = math.exp %42 : vector<8x8xf32>
    %cst_21 = arith.constant dense<0.000000e+00> : vector<8xf32>
    %44 = vector.multi_reduction <add>, %43, %cst_21 [1] : vector<8x8xf32> to vector<8xf32>
    %45 = vector.shape_cast %44 : vector<8xf32> to vector<8x1xf32>
    %46 = tpu.reciprocal %45 {approx = true} : vector<8x1xf32> -> vector<8x1xf32>
    %47 = vector.broadcast %46 : vector<8x1xf32> to vector<8x8xf32>
    %48 = arith.mulf %43, %47 : vector<8x8xf32>
    %49 = arith.truncf %48 : vector<8x8xf32> to vector<8x8xbf16>
    %c0_22 = arith.constant 0 : index
    %c0_23 = arith.constant 0 : index
    %c0_24 = arith.constant 0 : index
    %50 = vector.load %arg23[%c0_22, %c0_23, %c0_24] : memref<4x8x8xbf16, #tpu.memory_space<vmem>>, vector<1x8x8xbf16>
    %51 = vector.shape_cast %50 : vector<1x8x8xbf16> to vector<8x8xbf16>
    %cst_25 = arith.constant dense<0.000000e+00> : vector<8x8xf32>
    %52 = tpu.matmul %49, %51, %cst_25 {dimension_numbers = #tpu.dot_dimension_numbers<[1], [0], [0], [1], [0, 0, 1, 1], [], []>} : vector<8x8xbf16>, vector<8x8xbf16>, vector<8x8xf32> -> vector<8x8xf32>
    %53 = arith.truncf %52 : vector<8x8xf32> to vector<8x8xbf16>
    %c0_26 = arith.constant 0 : index
    %c0_27 = arith.constant 0 : index
    %54 = vector.load %arg24[%c0_26, %c0_27] : memref<8x32xbf16, #tpu.memory_space<vmem>>, vector<8x8xbf16>
    tpu.vector_store %arg24[%c0_26, %c0_27], %53 {strides = array<i32>} : memref<8x32xbf16, #tpu.memory_space<vmem>>, vector<8x8xbf16>,
    %55 = vector.extract_strided_slice %34 {offsets = [0, 8], sizes = [8, 8], strides = [1, 1]} : vector<8x32xbf16> to vector<8x8xbf16>
    %c1 = arith.constant 1 : index
    %c0_28 = arith.constant 0 : index
    %c0_29 = arith.constant 0 : index
    %56 = vector.load %arg22[%c1, %c0_28, %c0_29] : memref<4x8x8xbf16, #tpu.memory_space<vmem>>, vector<1x8x8xbf16>
    %57 = vector.shape_cast %56 : vector<1x8x8xbf16> to vector<8x8xbf16>
    %cst_30 = arith.constant dense<0.000000e+00> : vector<8x8xf32>
    %58 = tpu.matmul %55, %57, %cst_30 {dimension_numbers = #tpu.dot_dimension_numbers<[1], [1], [0], [0], [0, 0, 1, 0], [], []>} : vector<8x8xbf16>, vector<8x8xbf16>, vector<8x8xf32> -> vector<8x8xf32>
    %cst_31 = arith.constant dense<0xFF800000> : vector<8xf32>
    %59 = vector.multi_reduction <maximumf>, %58, %cst_31 [1] : vector<8x8xf32> to vector<8xf32>
    %60 = vector.shape_cast %59 : vector<8xf32> to vector<8x1xf32>
    %61 = vector.broadcast %60 : vector<8x1xf32> to vector<8x8xf32>
    %62 = arith.subf %58, %61 : vector<8x8xf32>
    %63 = math.exp %62 : vector<8x8xf32>
    %cst_32 = arith.constant dense<0.000000e+00> : vector<8xf32>
    %64 = vector.multi_reduction <add>, %63, %cst_32 [1] : vector<8x8xf32> to vector<8xf32>
    %65 = vector.shape_cast %64 : vector<8xf32> to vector<8x1xf32>
    %66 = tpu.reciprocal %65 {approx = true} : vector<8x1xf32> -> vector<8x1xf32>
    %67 = vector.broadcast %66 : vector<8x1xf32> to vector<8x8xf32>
    %68 = arith.mulf %63, %67 : vector<8x8xf32>
    %69 = arith.truncf %68 : vector<8x8xf32> to vector<8x8xbf16>
    %c1_33 = arith.constant 1 : index
    %c0_34 = arith.constant 0 : index
    %c0_35 = arith.constant 0 : index
    %70 = vector.load %arg23[%c1_33, %c0_34, %c0_35] : memref<4x8x8xbf16, #tpu.memory_space<vmem>>, vector<1x8x8xbf16>
    %71 = vector.shape_cast %70 : vector<1x8x8xbf16> to vector<8x8xbf16>
    %cst_36 = arith.constant dense<0.000000e+00> : vector<8x8xf32>
    %72 = tpu.matmul %69, %71, %cst_36 {dimension_numbers = #tpu.dot_dimension_numbers<[1], [0], [0], [1], [0, 0, 1, 1], [], []>} : vector<8x8xbf16>, vector<8x8xbf16>, vector<8x8xf32> -> vector<8x8xf32>
    %73 = arith.truncf %72 : vector<8x8xf32> to vector<8x8xbf16>
    %c0_37 = arith.constant 0 : index
    %c8 = arith.constant 8 : index
    %74 = vector.load %arg24[%c0_37, %c8] : memref<8x32xbf16, #tpu.memory_space<vmem>>, vector<8x8xbf16>
    tpu.vector_store %arg24[%c0_37, %c8], %73 {strides = array<i32>} : memref<8x32xbf16, #tpu.memory_space<vmem>>, vector<8x8xbf16>,
    %75 = vector.extract_strided_slice %34 {offsets = [0, 16], sizes = [8, 8], strides = [1, 1]} : vector<8x32xbf16> to vector<8x8xbf16>
    %c2 = arith.constant 2 : index
    %c0_38 = arith.constant 0 : index
    %c0_39 = arith.constant 0 : index
    %76 = vector.load %arg22[%c2, %c0_38, %c0_39] : memref<4x8x8xbf16, #tpu.memory_space<vmem>>, vector<1x8x8xbf16>
    %77 = vector.shape_cast %76 : vector<1x8x8xbf16> to vector<8x8xbf16>
    %cst_40 = arith.constant dense<0.000000e+00> : vector<8x8xf32>
    %78 = tpu.matmul %75, %77, %cst_40 {dimension_numbers = #tpu.dot_dimension_numbers<[1], [1], [0], [0], [0, 0, 1, 0], [], []>} : vector<8x8xbf16>, vector<8x8xbf16>, vector<8x8xf32> -> vector<8x8xf32>
    %cst_41 = arith.constant dense<0xFF800000> : vector<8xf32>
    %79 = vector.multi_reduction <maximumf>, %78, %cst_41 [1] : vector<8x8xf32> to vector<8xf32>
    %80 = vector.shape_cast %79 : vector<8xf32> to vector<8x1xf32>
    %81 = vector.broadcast %80 : vector<8x1xf32> to vector<8x8xf32>
    %82 = arith.subf %78, %81 : vector<8x8xf32>
    %83 = math.exp %82 : vector<8x8xf32>
    %cst_42 = arith.constant dense<0.000000e+00> : vector<8xf32>
    %84 = vector.multi_reduction <add>, %83, %cst_42 [1] : vector<8x8xf32> to vector<8xf32>
    %85 = vector.shape_cast %84 : vector<8xf32> to vector<8x1xf32>
    %86 = tpu.reciprocal %85 {approx = true} : vector<8x1xf32> -> vector<8x1xf32>
    %87 = vector.broadcast %86 : vector<8x1xf32> to vector<8x8xf32>
    %88 = arith.mulf %83, %87 : vector<8x8xf32>
    %89 = arith.truncf %88 : vector<8x8xf32> to vector<8x8xbf16>
    %c2_43 = arith.constant 2 : index
    %c0_44 = arith.constant 0 : index
    %c0_45 = arith.constant 0 : index
    %90 = vector.load %arg23[%c2_43, %c0_44, %c0_45] : memref<4x8x8xbf16, #tpu.memory_space<vmem>>, vector<1x8x8xbf16>
    %91 = vector.shape_cast %90 : vector<1x8x8xbf16> to vector<8x8xbf16>
    %cst_46 = arith.constant dense<0.000000e+00> : vector<8x8xf32>
    %92 = tpu.matmul %89, %91, %cst_46 {dimension_numbers = #tpu.dot_dimension_numbers<[1], [0], [0], [1], [0, 0, 1, 1], [], []>} : vector<8x8xbf16>, vector<8x8xbf16>, vector<8x8xf32> -> vector<8x8xf32>
    %93 = arith.truncf %92 : vector<8x8xf32> to vector<8x8xbf16>
    %c0_47 = arith.constant 0 : index
    %c16 = arith.constant 16 : index
    %94 = vector.load %arg24[%c0_47, %c16] : memref<8x32xbf16, #tpu.memory_space<vmem>>, vector<8x8xbf16>
    tpu.vector_store %arg24[%c0_47, %c16], %93 {strides = array<i32>} : memref<8x32xbf16, #tpu.memory_space<vmem>>, vector<8x8xbf16>,
    %95 = vector.extract_strided_slice %34 {offsets = [0, 24], sizes = [8, 8], strides = [1, 1]} : vector<8x32xbf16> to vector<8x8xbf16>
    %c3 = arith.constant 3 : index
    %c0_48 = arith.constant 0 : index
    %c0_49 = arith.constant 0 : index
    %96 = vector.load %arg22[%c3, %c0_48, %c0_49] : memref<4x8x8xbf16, #tpu.memory_space<vmem>>, vector<1x8x8xbf16>
    %97 = vector.shape_cast %96 : vector<1x8x8xbf16> to vector<8x8xbf16>
    %cst_50 = arith.constant dense<0.000000e+00> : vector<8x8xf32>
    %98 = tpu.matmul %95, %97, %cst_50 {dimension_numbers = #tpu.dot_dimension_numbers<[1], [1], [0], [0], [0, 0, 1, 0], [], []>} : vector<8x8xbf16>, vector<8x8xbf16>, vector<8x8xf32> -> vector<8x8xf32>
    %cst_51 = arith.constant dense<0xFF800000> : vector<8xf32>
    %99 = vector.multi_reduction <maximumf>, %98, %cst_51 [1] : vector<8x8xf32> to vector<8xf32>
    %100 = vector.shape_cast %99 : vector<8xf32> to vector<8x1xf32>
    %101 = vector.broadcast %100 : vector<8x1xf32> to vector<8x8xf32>
    %102 = arith.subf %98, %101 : vector<8x8xf32>
    %103 = math.exp %102 : vector<8x8xf32>
    %cst_52 = arith.constant dense<0.000000e+00> : vector<8xf32>
    %104 = vector.multi_reduction <add>, %103, %cst_52 [1] : vector<8x8xf32> to vector<8xf32>
    %105 = vector.shape_cast %104 : vector<8xf32> to vector<8x1xf32>
    %106 = tpu.reciprocal %105 {approx = true} : vector<8x1xf32> -> vector<8x1xf32>
    %107 = vector.broadcast %106 : vector<8x1xf32> to vector<8x8xf32>
    %108 = arith.mulf %103, %107 : vector<8x8xf32>
    %109 = arith.truncf %108 : vector<8x8xf32> to vector<8x8xbf16>
    %c3_53 = arith.constant 3 : index
    %c0_54 = arith.constant 0 : index
    %c0_55 = arith.constant 0 : index
    %110 = vector.load %arg23[%c3_53, %c0_54, %c0_55] : memref<4x8x8xbf16, #tpu.memory_space<vmem>>, vector<1x8x8xbf16>
    %111 = vector.shape_cast %110 : vector<1x8x8xbf16> to vector<8x8xbf16>
    %cst_56 = arith.constant dense<0.000000e+00> : vector<8x8xf32>
    %112 = tpu.matmul %109, %111, %cst_56 {dimension_numbers = #tpu.dot_dimension_numbers<[1], [0], [0], [1], [0, 0, 1, 1], [], []>} : vector<8x8xbf16>, vector<8x8xbf16>, vector<8x8xf32> -> vector<8x8xf32>
    %113 = arith.truncf %112 : vector<8x8xf32> to vector<8x8xbf16>
    %c0_57 = arith.constant 0 : index
    %c24 = arith.constant 24 : index
    %114 = vector.load %arg24[%c0_57, %c24] : memref<8x32xbf16, #tpu.memory_space<vmem>>, vector<8x8xbf16>
    tpu.vector_store %arg24[%c0_57, %c24], %113 {strides = array<i32>} : memref<8x32xbf16, #tpu.memory_space<vmem>>, vector<8x8xbf16>,
    %c0_58 = arith.constant 0 : index
    %c0_59 = arith.constant 0 : index
    %115 = vector.load %arg24[%c0_58, %c0_59] : memref<8x32xbf16, #tpu.memory_space<vmem>>, vector<8x32xbf16>
    %c0_60 = arith.constant 0 : index
    %c0_61 = arith.constant 0 : index
    %116 = vector.load %arg13[%c0_60, %c0_61] : memref<32x32xbf16, #tpu.memory_space<vmem>>, vector<32x32xbf16>
    %cst_62 = arith.constant dense<0.000000e+00> : vector<8x32xf32>
    %117 = tpu.matmul %115, %116, %cst_62 {dimension_numbers = #tpu.dot_dimension_numbers<[1], [0], [0], [1], [0, 0, 1, 1], [], []>} : vector<8x32xbf16>, vector<32x32xbf16>, vector<8x32xf32> -> vector<8x32xf32>
    %c0_63 = arith.constant 0 : index
    %c0_64 = arith.constant 0 : index
    %118 = vector.load %arg14[%c0_63, %c0_64] : memref<1x32xf32, #tpu.memory_space<vmem>>, vector<1x32xf32>
    %119 = vector.broadcast %118 : vector<1x32xf32> to vector<8x32xf32>
    %120 = arith.addf %117, %119 : vector<8x32xf32>
    %121 = arith.addf %11, %120 : vector<8x32xf32>
    %c0_65 = arith.constant 0 : index
    %c0_66 = arith.constant 0 : index
    %c0_67 = arith.constant 0 : index
    %122 = vector.load %arg5[%c0_65, %c0_66, %c0_67] : memref<1x1x32xf32, #tpu.memory_space<vmem>>, vector<1x1x32xf32>
    %123 = vector.shape_cast %122 : vector<1x1x32xf32> to vector<1x32xf32>
    %c0_68 = arith.constant 0 : index
    %c0_69 = arith.constant 0 : index
    %c0_70 = arith.constant 0 : index
    %124 = vector.load %arg6[%c0_68, %c0_69, %c0_70] : memref<1x1x32xf32, #tpu.memory_space<vmem>>, vector<1x1x32xf32>
    %125 = vector.shape_cast %124 : vector<1x1x32xf32> to vector<1x32xf32>
    %126 = arith.mulf %121, %121 : vector<8x32xf32>
    %cst_71 = arith.constant dense<0.000000e+00> : vector<8xf32>
    %127 = vector.multi_reduction <add>, %126, %cst_71 [1] : vector<8x32xf32> to vector<8xf32>
    %128 = vector.shape_cast %127 : vector<8xf32> to vector<8x1xf32>
    %cst_72 = arith.constant 3.200000e+01 : f32
    %129 = vector.broadcast %cst_72 : f32 to vector<8x1xf32>
    %130 = arith.divf %128, %129 : vector<8x1xf32>
    %cst_73 = arith.constant 9.99999997E-7 : f32
    %131 = vector.broadcast %cst_73 : f32 to vector<8x1xf32>
    %132 = arith.addf %130, %131 : vector<8x1xf32>
    %133 = math.rsqrt %132 : vector<8x1xf32>
    %134 = vector.broadcast %133 : vector<8x1xf32> to vector<8x32xf32>
    %135 = arith.mulf %121, %134 : vector<8x32xf32>
    %cst_74 = arith.constant 1.000000e+00 : f32
    %136 = vector.broadcast %cst_74 : f32 to vector<1x32xf32>
    %137 = arith.addf %136, %123 : vector<1x32xf32>
    %138 = vector.broadcast %137 : vector<1x32xf32> to vector<8x32xf32>
    %139 = arith.mulf %135, %138 : vector<8x32xf32>
    %140 = vector.broadcast %125 : vector<1x32xf32> to vector<8x32xf32>
    %141 = arith.addf %139, %140 : vector<8x32xf32>
    %142 = arith.truncf %141 : vector<8x32xf32> to vector<8x32xbf16>
    %c0_75 = arith.constant 0 : index
    %c0_76 = arith.constant 0 : index
    %143 = vector.load %arg15[%c0_75, %c0_76] : memref<32x128xbf16, #tpu.memory_space<vmem>>, vector<32x128xbf16>
    %cst_77 = arith.constant dense<0.000000e+00> : vector<8x128xf32>
    %144 = tpu.matmul %142, %143, %cst_77 {dimension_numbers = #tpu.dot_dimension_numbers<[1], [0], [0], [1], [0, 0, 1, 1], [], []>} : vector<8x32xbf16>, vector<32x128xbf16>, vector<8x128xf32> -> vector<8x128xf32>
    %c0_78 = arith.constant 0 : index
    %c0_79 = arith.constant 0 : index
    %145 = vector.load %arg16[%c0_78, %c0_79] : memref<1x128xf32, #tpu.memory_space<vmem>>, vector<1x128xf32>
    %146 = vector.broadcast %145 : vector<1x128xf32> to vector<8x128xf32>
    %147 = arith.addf %144, %146 : vector<8x128xf32>
    %c0_80 = arith.constant 0 : index
    %c0_81 = arith.constant 0 : index
    %148 = vector.load %arg17[%c0_80, %c0_81] : memref<32x128xbf16, #tpu.memory_space<vmem>>, vector<32x128xbf16>
    %cst_82 = arith.constant dense<0.000000e+00> : vector<8x128xf32>
    %149 = tpu.matmul %142, %148, %cst_82 {dimension_numbers = #tpu.dot_dimension_numbers<[1], [0], [0], [1], [0, 0, 1, 1], [], []>} : vector<8x32xbf16>, vector<32x128xbf16>, vector<8x128xf32> -> vector<8x128xf32>
    %c0_83 = arith.constant 0 : index
    %c0_84 = arith.constant 0 : index
    %150 = vector.load %arg18[%c0_83, %c0_84] : memref<1x128xf32, #tpu.memory_space<vmem>>, vector<1x128xf32>
    %151 = vector.broadcast %150 : vector<1x128xf32> to vector<8x128xf32>
    %152 = arith.addf %149, %151 : vector<8x128xf32>
    %153 = arith.negf %152 : vector<8x128xf32>
    %154 = math.exp %153 : vector<8x128xf32>
    %cst_85 = arith.constant 1.000000e+00 : f32
    %155 = vector.broadcast %cst_85 : f32 to vector<8x128xf32>
    %156 = arith.addf %155, %154 : vector<8x128xf32>
    %157 = arith.divf %155, %156 : vector<8x128xf32>
    %158 = arith.mulf %152, %157 : vector<8x128xf32>
    %159 = arith.mulf %158, %147 : vector<8x128xf32>
    %160 = arith.truncf %159 : vector<8x128xf32> to vector<8x128xbf16>
    %c0_86 = arith.constant 0 : index
    %c0_87 = arith.constant 0 : index
    %161 = vector.load %arg19[%c0_86, %c0_87] : memref<128x32xbf16, #tpu.memory_space<vmem>>, vector<128x32xbf16>
    %cst_88 = arith.constant dense<0.000000e+00> : vector<8x32xf32>
    %162 = tpu.matmul %160, %161, %cst_88 {dimension_numbers = #tpu.dot_dimension_numbers<[1], [0], [0], [1], [0, 0, 1, 1], [], []>} : vector<8x128xbf16>, vector<128x32xbf16>, vector<8x32xf32> -> vector<8x32xf32>
    %c0_89 = arith.constant 0 : index
    %c0_90 = arith.constant 0 : index
    %163 = vector.load %arg20[%c0_89, %c0_90] : memref<1x32xf32, #tpu.memory_space<vmem>>, vector<1x32xf32>
    %164 = vector.broadcast %163 : vector<1x32xf32> to vector<8x32xf32>
    %165 = arith.addf %162, %164 : vector<8x32xf32>
    %166 = arith.addf %121, %165 : vector<8x32xf32>
    %c0_91 = arith.constant 0 : index
    %c0_92 = arith.constant 0 : index
    %c0_93 = arith.constant 0 : index
    %167 = vector.load %arg21[%c0_91, %c0_92, %c0_93] : memref<1x8x32xf32, #tpu.memory_space<vmem>>, vector<1x8x32xf32>
    %168 = vector.shape_cast %167 : vector<1x8x32xf32> to vector<8x32xf32>
    %169 = vector.shape_cast %166 : vector<8x32xf32> to vector<1x8x32xf32>
    tpu.vector_store %arg21[%c0_91, %c0_92, %c0_93], %169 {strides = array<i32>} : memref<1x8x32xf32, #tpu.memory_space<vmem>>, vector<1x8x32xf32>,
    return
  }
  func.func @transform_0(%arg0: i32, %arg1: i32) -> (i32, i32, i32) {
    %c0_i32 = arith.constant 0 : i32
    %c0_i32_0 = arith.constant 0 : i32
    %c0_i32_1 = arith.constant 0 : i32
    return %arg0, %c0_i32, %c0_i32_0 : i32, i32, i32
  }
  func.func @transform_1(%arg0: i32, %arg1: i32) -> (i32, i32, i32) {
    %c0_i32 = arith.constant 0 : i32
    %c0_i32_0 = arith.constant 0 : i32
    %c0_i32_1 = arith.constant 0 : i32
    return %arg0, %c0_i32, %c0_i32_0 : i32, i32, i32
  }
  func.func @transform_2(%arg0: i32, %arg1: i32) -> (i32, i32, i32) {
    %c0_i32 = arith.constant 0 : i32
    %c0_i32_0 = arith.constant 0 : i32
    %c0_i32_1 = arith.constant 0 : i32
    return %arg0, %c0_i32, %c0_i32_0 : i32, i32, i32
  }
  func.func @transform_3(%arg0: i32, %arg1: i32) -> (i32, i32, i32) {
    %c0_i32 = arith.constant 0 : i32
    %c0_i32_0 = arith.constant 0 : i32
    %c0_i32_1 = arith.constant 0 : i32
    return %arg0, %c0_i32, %c0_i32_0 : i32, i32, i32
  }
  func.func @transform_4(%arg0: i32, %arg1: i32) -> (i32, i32, i32) {
    %c0_i32 = arith.constant 0 : i32
    %c0_i32_0 = arith.constant 0 : i32
    %c0_i32_1 = arith.constant 0 : i32
    return %arg0, %c0_i32, %c0_i32_0 : i32, i32, i32
  }
  func.func @transform_5(%arg0: i32, %arg1: i32) -> (i32, i32) {
    %c0_i32 = arith.constant 0 : i32
    %c0_i32_0 = arith.constant 0 : i32
    %c0_i32_1 = arith.constant 0 : i32
    return %c0_i32, %c0_i32_0 : i32, i32
  }
  func.func @transform_6(%arg0: i32, %arg1: i32) -> (i32, i32) {
    %c0_i32 = arith.constant 0 : i32
    %c0_i32_0 = arith.constant 0 : i32
    %c0_i32_1 = arith.constant 0 : i32
    return %c0_i32, %c0_i32_0 : i32, i32
  }
  func.func @transform_7(%arg0: i32, %arg1: i32) -> (i32, i32) {
    %c0_i32 = arith.constant 0 : i32
    %c0_i32_0 = arith.constant 0 : i32
    %c0_i32_1 = arith.constant 0 : i32
    return %c0_i32, %c0_i32_0 : i32, i32
  }
  func.func @transform_8(%arg0: i32, %arg1: i32) -> (i32, i32) {
    %c0_i32 = arith.constant 0 : i32
    %c0_i32_0 = arith.constant 0 : i32
    %c0_i32_1 = arith.constant 0 : i32
    return %c0_i32, %c0_i32_0 : i32, i32
  }
  func.func @transform_9(%arg0: i32, %arg1: i32) -> (i32, i32) {
    %c0_i32 = arith.constant 0 : i32
    %c0_i32_0 = arith.constant 0 : i32
    %c0_i32_1 = arith.constant 0 : i32
    return %c0_i32, %c0_i32_0 : i32, i32
  }
  func.func @transform_10(%arg0: i32, %arg1: i32) -> (i32, i32) {
    %c0_i32 = arith.constant 0 : i32
    %c0_i32_0 = arith.constant 0 : i32
    %c0_i32_1 = arith.constant 0 : i32
    return %c0_i32, %c0_i32_0 : i32, i32
  }
  func.func @transform_11(%arg0: i32, %arg1: i32) -> (i32, i32) {
    %c0_i32 = arith.constant 0 : i32
    %c0_i32_0 = arith.constant 0 : i32
    %c0_i32_1 = arith.constant 0 : i32
    return %c0_i32, %c0_i32_0 : i32, i32
  }
  func.func @transform_12(%arg0: i32, %arg1: i32) -> (i32, i32) {
    %c0_i32 = arith.constant 0 : i32
    %c0_i32_0 = arith.constant 0 : i32
    %c0_i32_1 = arith.constant 0 : i32
    return %c0_i32, %c0_i32_0 : i32, i32
  }
  func.func @transform_13(%arg0: i32, %arg1: i32) -> (i32, i32) {
    %c0_i32 = arith.constant 0 : i32
    %c0_i32_0 = arith.constant 0 : i32
    %c0_i32_1 = arith.constant 0 : i32
    return %c0_i32, %c0_i32_0 : i32, i32
  }
  func.func @transform_14(%arg0: i32, %arg1: i32) -> (i32, i32) {
    %c0_i32 = arith.constant 0 : i32
    %c0_i32_0 = arith.constant 0 : i32
    %c0_i32_1 = arith.constant 0 : i32
    return %c0_i32, %c0_i32_0 : i32, i32
  }
  func.func @transform_15(%arg0: i32, %arg1: i32) -> (i32, i32) {
    %c0_i32 = arith.constant 0 : i32
    %c0_i32_0 = arith.constant 0 : i32
    %c0_i32_1 = arith.constant 0 : i32
    return %c0_i32, %c0_i32_0 : i32, i32
  }
  func.func @transform_16(%arg0: i32, %arg1: i32) -> (i32, i32) {
    %c0_i32 = arith.constant 0 : i32
    %c0_i32_0 = arith.constant 0 : i32
    %c0_i32_1 = arith.constant 0 : i32
    return %c0_i32, %c0_i32_0 : i32, i32
  }
  func.func @transform_17(%arg0: i32, %arg1: i32) -> (i32, i32) {
    %c0_i32 = arith.constant 0 : i32
    %c0_i32_0 = arith.constant 0 : i32
    %c0_i32_1 = arith.constant 0 : i32
    return %c0_i32, %c0_i32_0 : i32, i32
  }
  func.func @transform_18(%arg0: i32, %arg1: i32) -> (i32, i32) {
    %c0_i32 = arith.constant 0 : i32
    %c0_i32_0 = arith.constant 0 : i32
    %c0_i32_1 = arith.constant 0 : i32
    return %c0_i32, %c0_i32_0 : i32, i32
  }
  func.func @transform_19(%arg0: i32, %arg1: i32) -> (i32, i32, i32) {
    %c0_i32 = arith.constant 0 : i32
    %c0_i32_0 = arith.constant 0 : i32
    return %arg0, %arg1, %c0_i32 : i32, i32, i32
  }
}

</mosaic_0001>

<bundles_post_ra>
// kernel: tpu_custom_call.1
= control target key start
LH: loop header
LB: loop body
LE: loop exit
PB: predicated region body
PF: predicated region fallthrough
CT: control target
= control target key end

     0   :  { %s3485_s0 = inlined_call_operand.vmem [shape: f32[2,8,32], index: 0, kind: input, shape index: {}]   ;;  %s3486_s1 = inlined_call_operand.hbm [shape: f32[2,1,32], index: 1, kind: input, shape index: {}]   ;;  %s3487_s2 = inlined_call_operand.hbm [shape: f32[2,1,32], index: 2, kind: input, shape index: {}]   ;;  %s3488_s3 = inlined_call_operand.hbm [shape: f32[2,1,32], index: 3, kind: input, shape index: {}]   ;;  %s3489_s4 = inlined_call_operand.hbm [shape: f32[2,1,32], index: 4, kind: input, shape index: {}]   ;;  %s3490_s5 = inlined_call_operand.vmem [shape: bf16[32,32], index: 5, kind: input, shape index: {}]   ;;  %s3491_s6 = inlined_call_operand.vmem [shape: bf16[32,32], index: 6, kind: input, shape index: {}]   ;;  %s3492_s7 = inlined_call_operand.vmem [shape: bf16[32,32], index: 7, kind: input, shape index: {}]   ;;  %s3493_s8 = inlined_call_operand.vmem [shape: f32[1,32], index: 8, kind: input, shape index: {}]   ;;  %s3494_s9 = inlined_call_operand.hbm [shape: f32[1,32], index: 9, kind: input, shape index: {}]   ;;  %s3495_s10 = inlined_call_operand.hbm [shape: f32[1,32], index: 10, kind: input, shape index: {}]   ;;  %s3496_s11 = inlined_call_operand.vmem [shape: bf16[32,32], index: 11, kind: input, shape index: {}]   ;;  %s3497_s12 = inlined_call_operand.hbm [shape: f32[1,32], index: 12, kind: input, shape index: {}]   ;;  %s3498_s13 = inlined_call_operand.vmem [shape: bf16[32,128], index: 13, kind: input, shape index: {}]   ;;  %s3499_s14 = inlined_call_operand.vmem [shape: f32[1,128], index: 14, kind: input, shape index: {}]   ;;  %s3500_s15 = inlined_call_operand.vmem [shape: bf16[32,128], index: 15, kind: input, shape index: {}]   ;;  %s3501_s16 = inlined_call_operand.vmem [shape: f32[1,128], index: 16, kind: input, shape index: {}]   ;;  %s3502_s17 = inlined_call_operand.vmem [shape: bf16[128,32], index: 17, kind: input, shape index: {}]   ;;  %s3503_s18 = inlined_call_operand.vmem [shape: f32[1,32], index: 18, kind: input, shape index: {}]   ;;  %s3504_s19 = inlined_call_operand.hbm [shape: f32[2,8,32], index: 19, kind: output, shape index: {}]  }
   0x1   :  { %3530 = sst [smem:[#allocation31_spill]] %s3485_s0 }
   0x2   :  { %3531 = sst [smem:[#allocation32_spill]] %s3486_s1 }
   0x3   :  { %3532 = sst [smem:[#allocation33_spill]] %s3487_s2 }
   0x4   :  { %3533 = sst [smem:[#allocation34_spill]] %s3488_s3 }
   0x5   :  { %3534 = sst [smem:[#allocation35_spill]] %s3494_s9 }
   0x6   :  { %3535 = sst [smem:[#allocation36_spill]] %s3495_s10 }
   0x7   :  { %3536 = sst [smem:[#allocation37_spill]] %s3498_s13 }
   0x8   :  { %3537 = sst [smem:[#allocation38_spill]] %s3499_s14 }
   0x9   :  { %3538 = sst [smem:[#allocation39_spill]] %s3500_s15 }
   0xa   :  { %3539 = sst [smem:[#allocation40_spill]] %s3501_s16 }
   0xb   :  { %3540 = sst [smem:[#allocation41_spill]] %s3502_s17 }
   0xc   :  { %3541 = sst [smem:[#allocation42_spill]] %s3503_s18 }
   0xd   :  { %3542 = sst [smem:[#allocation43_spill]] %s3504_s19 }
   0xe   :  { %24 = vsyncpa [#allocation6], 0 }
   0xf   :  { %26 = vsyncpa [#allocation6 + $0x1], 0 }
  0x10   :  { %27 = vsyncpa [#allocation9], 0 }
  0x11   :  { %29 = vsyncpa [#allocation9 + $0x1], 0 }
  0x12   :  { %30 = vsyncpa [#allocation12], 0 }
  0x13   :  { %32 = vsyncpa [#allocation12 + $0x1], 0 }
  0x14   :  { %33 = vsyncpa [#allocation15], 0 }
  0x15   :  { %34 = vsyncpa [#allocation7], 0 }
  0x16   :  { %36 = vsyncpa [#allocation7 + $0x1], 0  ;;  %s2902_s0 = smov 0   ;;  %s2904_s30 = smov 0  }
  0x17   :  { %s2906_s20 = smov 0   ;;  %s2908_s21 = smov 0  }
  0x18   :  { %s2910_s1 = smov 0   ;;  %s2912_s22 = smov 0  }
  0x19 LB: > { %3543 = sst [smem:[#allocation24_spill]] %s2764_s0  ;;  %s2933_s2 = sadd.s32 4294967295, %s2784_s22   ;;  %s2784_s22 = sphi %s2912_s22, %s42_s22   ;;  %s2780_s1 = sphi %s2910_s1, %s3594_s1   ;;  %s2776_s21 = sphi %s2908_s21, %s3593_s21   ;;  %s2772_s20 = sphi %s2906_s20, %s3592_s20   ;;  %s2768_s30 = sphi %s2904_s30, %s3596_s30   ;;  %s2764_s0 = sphi %s2902_s0, %s3595_s0  }
  0x1a   : > { %3544 = sst [smem:[#allocation25_spill]] %s2772_s20  ;;  %s2087_s23 = sadd.s32 4294967294, %s2784_s22  }
  0x1b   : > { %3545 = sst [smem:[#allocation26_spill]] %s2780_s1  ;;  %p100_p0 = scmp.ne.s32.totalorder %s2768_s30, %s2764_s0 }
  0x1c   : > { %p3511_p1 = scmp.eq.s32.totalorder %s2933_s2, 0  ;;  %p504_p3 = scmp.eq.s32.totalorder %s2087_s23, 1 }
  0x1d   : > { %p2088_p5 = scmp.ge.s32.totalorder %s2784_s22, 1  ;;  %p511_p7 = scmp.lt.s32.totalorder %s2784_s22, 3 }
  0x1e   : > { %p2942_p4 = por %p3511_p1, %p100_p0  ;;  %p2947_p6 = por %p504_p3, %p100_p0 }
  0x1f   : > { %p2952_p8 = pnand %p2088_p5, %p511_p7  ;;  %s2786_s26 = smov [#allocation13]  }
  0x20   : > { %s3546_s24 = scalar_select %p2942_p4, 1, 0 }
  0x21   : > { %s3547_s25 = scalar_select %p2947_p6, 1, 0 }
  0x22   : > { %s3549_s3 = scalar_select %p2952_p8, 1, 0 }
  0x23   : > { %3548 = sst [smem:[#allocation27_spill]] %s3547_s25  ;;  %s536_s27 = sshll.u32 %s2786_s26, 4  ;;  %s537_s27 = int_to_ptr.vmem [resolvable:$true] %s536_s27 }
  0x24   : > { %p2342_p10 = pneg %p2952_p8  ;;  %s2787_s28 = smov [#allocation14]  }
  0x25   : > { %s547_s29 = sshll.u32 %s2787_s28, 4  ;;  %s3551_s9 = sld [smem:[#allocation35_spill]]  ;;  %s2965_s29 = int_to_ptr.vmem [resolvable:$true] %s547_s29 }
  0x26   : > { %p2961_p11 = pnand %p2342_p10, %p3511_p1 }
  0x28   : > { %s3550_s23 = scalar_select %p2961_p11, 1, 0 }
  0x29   : > { %p2975_p13 = pneg %p2961_p11 }
  0x2b   : > { %s2482_s19 = scalar_lea.hbm %s3551_s9, 16 }
  0x2c   : > { %p2483_p12 = scmp.ne.s32.totalorder %s3551_s9, %s2482_s19  ;;  %p2489_p5 = scmp.lt.u32.totalorder %s2482_s19, %s3551_s9 }
  0x2d   : > { %s3552_s14 = scalar_select %p2975_p13, 1, 0 }
  0x2e   : > { %p2485_p0 = pnand %p2975_p13, %p2483_p12 }
  0x30   : > { %p2486_p3 = pneg %p2485_p0 }
  0x32   : > { %p2491_p7 = pnand %p2489_p5, %p2486_p3 }
  0x34   : > { %2494 = shalt.err (!%p2491_p7)
}
  0x35   : > { %s2495_s0 = scalar_lea.vmem %s537_s27, 16  ;;  %s2502_s18 = scalar_lea.vmem %s537_s27, 32 }
  0x36   : > { %p2496_p10 = scmp.ne.s32.totalorder %s537_s27, %s2495_s0  ;;  %p2503_p2 = scmp.lt.s32.totalorder %s537_s27, %s537_s27 }
  0x37   : > { %p2504_p6 = scmp.lt.s32.totalorder %s2502_s18, %s2495_s0 }
  0x38   : > { %p2498_p9 = pnand %p2496_p10, %p2975_p13 }
  0x39   : > { %p2505_p4 = por %p2504_p6, %p2503_p2 }
  0x3a   : > { %p2499_p1 = pneg %p2498_p9 }
  0x3c   : > { %p2506_p8 = pnand %p2505_p4, %p2499_p1 }
  0x3e   : > { %2509 = shalt.err (!%p2506_p8)
}
  0x3f   : > { %2345 = dma.hbm_to_vmem [thread:$0]  (!%p2961_p11), %s3551_s9, 16, %s537_s27, [#allocation12]  }
  0x40   : > { %s3553_s10 = sld [smem:[#allocation36_spill]] }
  0x46   : > { %s2510_s28 = scalar_lea.hbm %s3553_s10, 16 }
  0x47   : > { %p2511_p9 = scmp.ne.s32.totalorder %s3553_s10, %s2510_s28  ;;  %p2517_p1 = scmp.lt.u32.totalorder %s2510_s28, %s3553_s10 }
  0x49   : > { %p2513_p12 = pnand %p2511_p9, %p2975_p13 }
  0x4b   : > { %p2514_p2 = pneg %p2513_p12 }
  0x4d   : > { %p2519_p4 = pnand %p2517_p1, %p2514_p2 }
  0x4f   : > { %2522 = shalt.err (!%p2519_p4)
}
  0x50   : > { %s2523_s27 = scalar_lea.vmem %s2965_s29, 16  ;;  %s2530_s15 = scalar_lea.vmem %s2965_s29, 32 }
  0x51   : > { %p2524_p6 = scmp.ne.s32.totalorder %s2965_s29, %s2523_s27  ;;  %p2531_p3 = scmp.lt.s32.totalorder %s2965_s29, %s2965_s29 }
  0x52   : > { %p2532_p5 = scmp.lt.s32.totalorder %s2530_s15, %s2523_s27 }
  0x53   : > { %p2526_p8 = pnand %p2524_p6, %p2975_p13 }
  0x54   : > { %p2533_p7 = por %p2532_p5, %p2531_p3 }
  0x55   : > { %p2527_p0 = pneg %p2526_p8 }
  0x57   : > { %p2534_p10 = pnand %p2533_p7, %p2527_p0 }
  0x59   : > { %2537 = shalt.err (!%p2534_p10)
}
  0x5a   : > { %2348 = dma.hbm_to_vmem [thread:$0]  (!%p2961_p11), %s3553_s10, 16, %s2965_s29, [#allocation15]  }
  0x5b   : > { %s54_s26 = sadd.s32 1, %s2780_s1  ;;  %s87_s16 = sadd.s32 1, %s2772_s20 }
  0x5c   : > { %p56_p9 = scmp.ge.s32.totalorder %s54_s26, 2  ;;  %p94_p12 = scmp.ne.s32.totalorder %s2772_s20, %s2768_s30 }
  0x5d   : > { %p95_p2 = scmp.eq.s32.totalorder %s2784_s22, 0  ;;  %p2372_p1 = scmp.lt.s32.totalorder %s2784_s22, 2 }
  0x5e   : > { %s3598_s26 = smov (%p56_p9, %s54_s26), 0  ;;  %p3555_p6 = scmp.eq.s32.totalorder %s2933_s2, 1 }
  0x5f   : > { %3554 = sst [smem:[#allocation28_spill]] %s3598_s26  ;;  %p96_p4 = por %p95_p2, %p94_p12 }
  0x60   : > { %p3025_p8 = por %p3555_p6, %p94_p12  ;;  %s84_s28 = ssub.s32 %s2780_s1, %s3598_s26 }
  0x61   : > { %s3032_s0 = sand.u32 1, %s2772_s20   ;;  %p85_p0 = scmp.eq.s32.totalorder %s84_s28, 0 }
  0x62   : > { %s3556_s19 = scalar_select %p3025_p8, 1, 0 }
  0x63   : > { %s3035_s29 = sshll.u32 %s2780_s1, 4  ;;  %p3037_p3 = pnand %p2372_p1, %p96_p4 }
  0x64   : > { %3557 = sst [smem:[#allocation29_spill]] %s3556_s19  ;;  %s3521_s27 = sand.u32 1, %s2784_s22  }
  0x65   : > { %s3558_s18 = scalar_select %p3037_p3, 1, 0 }
  0x66   : > { %s3043_s15 = scalar_select %p85_p0, %s2772_s20, %s87_s16  }
  0x67   : > { %s3560_s9 = sld [smem:[#allocation33_spill]]  ;;  %s617_s28 = scalar_lea.vmem [#allocation8], %s3032_s0 }
  0x68   : > { %3559 = sst [smem:[#allocation30_spill]] %s3043_s15  ;;  %s624_s26 = sshll.u32 %s617_s28, 4  ;;  %s3052_s26 = int_to_ptr.vmem [resolvable:$true] %s624_s26 }
  0x69   : > { %s3056_s1 = scalar_lea.sflag [#allocation9], %s3521_s27  ;;  %p3062_p7 = pneg %p3037_p3 }
  0x6d   : > { %s3049_s10 = scalar_lea.hbm %s3560_s9, %s3035_s29  ;;  %s2543_s28 = scalar_lea.hbm %s3560_s9, 32 }
  0x6e   : > { %s2538_s19 = scalar_lea.hbm %s3049_s10, 16  ;;  %p2544_p12 = scmp.lt.u32.totalorder %s3049_s10, %s3560_s9 }
  0x6f   : > { %p2539_p5 = scmp.ne.s32.totalorder %s3049_s10, %s2538_s19  ;;  %p2545_p2 = scmp.lt.u32.totalorder %s2543_s28, %s2538_s19 }
  0x70   : > { %p2547_p4 = scmp.lt.u32.totalorder %s2538_s19, %s3049_s10 }
  0x71   : > { %p2541_p10 = pnand %p3062_p7, %p2539_p5  ;;  %p2546_p1 = por %p2545_p2, %p2544_p12 }
  0x73   : > { %p2542_p9 = pneg %p2541_p10  ;;  %p2548_p6 = por %p2547_p4, %p2546_p1 }
  0x75   : > { %p2549_p0 = pnand %p2548_p6, %p2542_p9 }
  0x77   : > { %2552 = shalt.err (!%p2549_p0)
}
  0x78   : > { %s2553_s27 = scalar_lea.vmem %s3052_s26, 16  ;;  %s2788_s17 = smov [#allocation8]  }
  0x79   : > { %p2554_p5 = scmp.ne.s32.totalorder %s3052_s26, %s2553_s27  ;;  %s2558_s25 = sshll.u32 %s2788_s17, 4  ;;  %s2559_s25 = int_to_ptr.vmem [resolvable:$false] %s2558_s25 }
  0x7a   : > { %s2560_s20 = scalar_lea.vmem %s2559_s25, 32  ;;  %p2561_p11 = scmp.lt.s32.totalorder %s3052_s26, %s2559_s25 }
  0x7b   : > { %p2556_p10 = pnand %p2554_p5, %p3062_p7  ;;  %p2562_p13 = scmp.lt.s32.totalorder %s2560_s20, %s2553_s27 }
  0x7d   : > { %p2557_p8 = pneg %p2556_p10  ;;  %p2563_p12 = por %p2562_p13, %p2561_p11 }
  0x7f   : > { %p2564_p2 = pnand %p2563_p12, %p2557_p8 }
  0x81   : > { %2567 = shalt.err (!%p2564_p2)
}
  0x82   : > { %2358 = dma.hbm_to_vmem [thread:$0]  (!%p3037_p3), %s3049_s10, 16, %s3052_s26, %s3056_s1  }
  0x83   : > { %s2789_s19 = smov [#allocation16]   ;;  %s2568_s17 = scalar_lea.hbm %s3497_s12, 16 }
  0x84   : > { %s561_s15 = sshll.u32 %s2789_s19, 4  ;;  %p2569_p11 = scmp.ne.s32.totalorder %s3497_s12, %s2568_s17  ;;  %s562_s15 = int_to_ptr.vmem [resolvable:$true] %s561_s15 }
  0x85   : > { %p3562_p13 = scmp.ne.s32.totalorder %s3552_s14, 0  ;;  %p2575_p1 = scmp.lt.u32.totalorder %s2568_s17, %s3497_s12 }
  0x87   : > { %p2571_p8 = pnand %p2569_p11, %p3562_p13 }
  0x89   : > { %p2572_p9 = pneg %p2571_p8 }
  0x8b   : > { %p2577_p4 = pnand %p2575_p1, %p2572_p9 }
  0x8d   : > { %2580 = shalt.err (!%p2577_p4)
}
  0x8e   : > { %s2581_s10 = scalar_lea.vmem %s562_s15, 16  ;;  %s2588_s9 = scalar_lea.vmem %s562_s15, 32 }
  0x8f   : > { %p2582_p6 = scmp.ne.s32.totalorder %s562_s15, %s2581_s10  ;;  %p2589_p10 = scmp.lt.s32.totalorder %s562_s15, %s562_s15 }
  0x90   : > { %p2590_p12 = scmp.lt.s32.totalorder %s2588_s9, %s2581_s10 }
  0x91   : > { %p2584_p0 = pnand %p2582_p6, %p3562_p13 }
  0x92   : > { %p2591_p2 = por %p2590_p12, %p2589_p10 }
  0x93   : > { %p2585_p5 = pneg %p2584_p0 }
  0x95   : > { %p2592_p3 = pnand %p2591_p2, %p2585_p5 }
  0x97   : > { %2595 = shalt.err (!%p2592_p3)
}
  0x98   : > { %p3563_p11 = scmp.ne.s32.totalorder %s3550_s23, 0  ;;  %s3564_s28 = sld [smem:[#allocation32_spill]] }
  0x99   : > { %s600_s25 = scalar_lea.vmem [#allocation5], %s3032_s0  ;;  %s598_s23 = scalar_lea.sflag [#allocation6], %s3032_s0 }
  0x9a   : > { %2351 = dma.hbm_to_vmem [thread:$0]  (!%p3563_p11), %s3497_s12, 16, %s562_s15, [#allocation15]  }
  0x9b   : > { %s607_s27 = sshll.u32 %s600_s25, 4  ;;  %s608_s27 = int_to_ptr.vmem [resolvable:$true] %s607_s27 }
  0x9e   : > { %s3108_s17 = scalar_lea.hbm %s3564_s28, %s3035_s29  ;;  %s2601_s9 = scalar_lea.hbm %s3564_s28, 32 }
  0x9f   : > { %s2596_s20 = scalar_lea.hbm %s3108_s17, 16  ;;  %p2602_p9 = scmp.lt.u32.totalorder %s3108_s17, %s3564_s28 }
  0xa0   : > { %p2597_p3 = scmp.ne.s32.totalorder %s3108_s17, %s2596_s20  ;;  %p2603_p1 = scmp.lt.u32.totalorder %s2601_s9, %s2596_s20 }
  0xa1   : > { %p2605_p6 = scmp.lt.u32.totalorder %s2596_s20, %s3108_s17 }
  0xa2   : > { %p2599_p13 = pnand %p2597_p3, %p3062_p7  ;;  %p2604_p4 = por %p2603_p1, %p2602_p9 }
  0xa4   : > { %p2600_p8 = pneg %p2599_p13  ;;  %p2606_p0 = por %p2605_p6, %p2604_p4 }
  0xa6   : > { %p2607_p5 = pnand %p2606_p0, %p2600_p8 }
  0xa8   : > { %2610 = shalt.err (!%p2607_p5)
}
  0xa9   : > { %s2611_s19 = scalar_lea.vmem %s608_s27, 16  ;;  %s2790_s14 = smov [#allocation5]  }
  0xaa   : > { %p2612_p10 = scmp.ne.s32.totalorder %s608_s27, %s2611_s19  ;;  %s2616_s25 = sshll.u32 %s2790_s14, 4  ;;  %s2617_s25 = int_to_ptr.vmem [resolvable:$false] %s2616_s25 }
  0xab   : > { %s2618_s10 = scalar_lea.vmem %s2617_s25, 32  ;;  %p2619_p11 = scmp.lt.s32.totalorder %s608_s27, %s2617_s25 }
  0xac   : > { %p2614_p12 = pnand %p2612_p10, %p3062_p7  ;;  %p2620_p3 = scmp.lt.s32.totalorder %s2618_s10, %s2611_s19 }
  0xae   : > { %p2615_p2 = pneg %p2614_p12  ;;  %p2621_p13 = por %p2620_p3, %p2619_p11 }
  0xb0   : > { %p2622_p1 = pnand %p2621_p13, %p2615_p2 }
  0xb2   : > { %2625 = shalt.err (!%p2622_p1)
}
  0xb3   : > { %p3565_p9 = scmp.ne.s32.totalorder %s3558_s18, 0  ;;  %s3566_s9 = sld [smem:[#allocation34_spill]] }
  0xb4   : > { %s634_s26 = scalar_lea.vmem [#allocation10], %s3032_s0 }
  0xb5   : > { %2355 = dma.hbm_to_vmem [thread:$0]  (!%p3565_p9), %s3108_s17, 16, %s608_s27, %s598_s23  }
  0xb6   : > { %s641_s19 = sshll.u32 %s634_s26, 4  ;;  %s642_s19 = int_to_ptr.vmem [resolvable:$true] %s641_s19 }
  0xb9   : > { %s3133_s13 = scalar_lea.hbm %s3566_s9, %s3035_s29  ;;  %s2631_s17 = scalar_lea.hbm %s3566_s9, 32 }
  0xba   : > { %s2626_s14 = scalar_lea.hbm %s3133_s13, 16  ;;  %p2632_p0 = scmp.lt.u32.totalorder %s3133_s13, %s3566_s9 }
  0xbb   : > { %p2627_p8 = scmp.ne.s32.totalorder %s3133_s13, %s2626_s14  ;;  %p2633_p5 = scmp.lt.u32.totalorder %s2631_s17, %s2626_s14 }
  0xbc   : > { %p2635_p12 = scmp.lt.u32.totalorder %s2626_s14, %s3133_s13 }
  0xbd   : > { %p2629_p4 = pnand %p2627_p8, %p3062_p7  ;;  %p2634_p10 = por %p2633_p5, %p2632_p0 }
  0xbf   : > { %p2630_p6 = pneg %p2629_p4  ;;  %p2636_p2 = por %p2635_p12, %p2634_p10 }
  0xc1   : > { %p2637_p11 = pnand %p2636_p2, %p2630_p6 }
  0xc3   : > { %2640 = shalt.err (!%p2637_p11)
}
  0xc4   : > { %s2641_s20 = scalar_lea.vmem %s642_s19, 16  ;;  %s2791_s15 = smov [#allocation10]  }
  0xc5   : > { %p2642_p3 = scmp.ne.s32.totalorder %s642_s19, %s2641_s20  ;;  %s2646_s26 = sshll.u32 %s2791_s15, 4  ;;  %s2647_s26 = int_to_ptr.vmem [resolvable:$false] %s2646_s26 }
  0xc6   : > { %s2648_s25 = scalar_lea.vmem %s2647_s26, 32  ;;  %p2649_p8 = scmp.lt.s32.totalorder %s642_s19, %s2647_s26 }
  0xc7   : > { %p2644_p13 = pnand %p2642_p3, %p3062_p7  ;;  %p2650_p4 = scmp.lt.s32.totalorder %s2648_s25, %s2641_s20 }
  0xc9   : > { %p2645_p1 = pneg %p2644_p13  ;;  %p2651_p9 = por %p2650_p4, %p2649_p8 }
  0xcb   : > { %p2652_p0 = pnand %p2651_p9, %p2645_p1 }
  0xcd   : > { %2655 = shalt.err (!%p2652_p0)
}
  0xce   : > { %p3567_p5 = scmp.ne.s32.totalorder %s3558_s18, 0  ;;  %s3158_s17 = scalar_lea.hbm %s3489_s4, %s3035_s29 }
  0xcf   : > { %s651_s27 = scalar_lea.vmem [#allocation11], %s3032_s0  ;;  %s3568_s20 = sand.u32 1, %s2784_s22  }
  0xd0   : > { %2361 = dma.hbm_to_vmem [thread:$0]  (!%p3567_p5), %s3133_s13, 16, %s642_s19, %s3056_s1  }
  0xd1   : > { %s658_s23 = sshll.u32 %s651_s27, 4  ;;  %s649_s15 = scalar_lea.sflag [#allocation12], %s3568_s20  ;;  %s659_s23 = int_to_ptr.vmem [resolvable:$true] %s658_s23 }
  0xd2   : > { %s2656_s26 = scalar_lea.hbm %s3158_s17, 16  ;;  %s2661_s19 = scalar_lea.hbm %s3489_s4, 32 }
  0xd3   : > { %p2657_p9 = scmp.ne.s32.totalorder %s3158_s17, %s2656_s26  ;;  %p2662_p12 = scmp.lt.u32.totalorder %s3158_s17, %s3489_s4 }
  0xd4   : > { %p2663_p2 = scmp.lt.u32.totalorder %s2661_s19, %s2656_s26  ;;  %p2665_p3 = scmp.lt.u32.totalorder %s2656_s26, %s3158_s17 }
  0xd5   : > { %p2659_p6 = pnand %p2657_p9, %p3062_p7 }
  0xd6   : > { %p2664_p11 = por %p2663_p2, %p2662_p12 }
  0xd7   : > { %p2660_p10 = pneg %p2659_p6 }
  0xd8   : > { %p2666_p13 = por %p2665_p3, %p2664_p11 }
  0xda   : > { %p2667_p1 = pnand %p2666_p13, %p2660_p10 }
  0xdc   : > { %2670 = shalt.err (!%p2667_p1)
}
  0xdd   : > { %s2671_s0 = scalar_lea.vmem %s659_s23, 16  ;;  %s2792_s14 = smov [#allocation11]  }
  0xde   : > { %p2672_p8 = scmp.ne.s32.totalorder %s659_s23, %s2671_s0  ;;  %s2676_s10 = sshll.u32 %s2792_s14, 4  ;;  %s2677_s10 = int_to_ptr.vmem [resolvable:$false] %s2676_s10 }
  0xdf   : > { %s2678_s27 = scalar_lea.vmem %s2677_s10, 32  ;;  %p2679_p9 = scmp.lt.s32.totalorder %s659_s23, %s2677_s10 }
  0xe0   : > { %p2674_p4 = pnand %p2672_p8, %p3062_p7  ;;  %p2680_p6 = scmp.lt.s32.totalorder %s2678_s27, %s2671_s0 }
  0xe2   : > { %p2675_p0 = pneg %p2674_p4  ;;  %p2681_p5 = por %p2680_p6, %p2679_p9 }
  0xe4   : > { %p2682_p2 = pnand %p2681_p5, %p2675_p0 }
  0xe6   : > { %2685 = shalt.err (!%p2682_p2)
}
  0xe7   : > { %p3569_p12 = scmp.ne.s32.totalorder %s3558_s18, 0  ;;  %p3570_p10 = scmp.ne.s32.totalorder %s3549_s3, 0 }
  0xe8   : > { %s3183_s16 = sand.u32 (!%p3570_p10), 1, %s2768_s30   ;;  %p3571_p7 = scmp.ne.s32.totalorder (!%p3570_p10), %s3546_s24, 0 }
  0xe9   : > { %2364 = dma.hbm_to_vmem [thread:$0]  (!%p3569_p12), %s3158_s17, 16, %s659_s23, %s649_s15  }
  0xea   : > { %667 = sbr.rel (%p3570_p10) target bundleno = 2556 (0x9fc), region = 96  ;;  %s670_s20 = scalar_lea.sflag (!%p3570_p10), [#allocation6], %s3183_s16 }
  0xeb   : > { %s672_s26 = scalar_lea.vmem (!%p3570_p10), [#allocation5], %s3183_s16 }
  0xf1   : > { %2739 = dma.done.wait (%p3571_p7), %s670_s20, 16  }
  0xf2   : > { %2741 = vsyncadd (%p3571_p7), %s670_s20, 4294967280  ;;  %s677_s18 = sand.u32 1, %s2933_s2   ;;  %s680_s3 = scalar_lea.vmem [#allocation8], %s3183_s16 }
  0xf3   : > { %s678_s17 = scalar_lea.sflag [#allocation9], %s677_s18 }
  0xf4   : > { %2743 = dma.done.wait (%p3571_p7), %s678_s17, 32  }
  0xf5   : > { %2745 = vsyncadd (%p3571_p7), %s678_s17, 4294967264  ;;  %s688_s23 = scalar_lea.vmem [#allocation10], %s3183_s16  ;;  %s694_s15 = scalar_lea.sflag [#allocation12], %s677_s18 }
  0xf6   : > { %s696_s1 = scalar_lea.vmem [#allocation11], %s3183_s16 }
  0xf7   : > { %2747 = dma.done.wait (%p3571_p7), %s694_s15, 16  }
  0xf8   : > { %2749 = vsyncadd (%p3571_p7), %s694_s15, 4294967280  ;;  %p3572_p5 = scmp.eq.s32.totalorder %s2933_s2, 0 }
  0xfa   : > { %2751 = dma.done.wait (%p3572_p5), [#allocation12], 16   ;;  %p3573_p11 = pmov %p3572_p5 }
  0xfb   : > { %p3574_p3 = pmov %p3572_p5 }
  0xfc   : > { %2753 = vsyncadd (%p3573_p11), [#allocation12], 4294967280 }
  0xfd   : > { %2755 = dma.done.wait (%p3574_p3), [#allocation15], 32   ;;  %p3575_p13 = pmov %p3574_p3 }
  0xfe   : > { %p778_p1 = scmp.lt.s32.totalorder %s2776_s21, 1  ;;  %s3576_s25 = sld [smem:[#allocation31_spill]]  ;;  %vm791_vm0 = vcmask 261120   ;;  %v2793_v3 = vmov 0.0   ;;  %v2436_v4 = vld [vmem:[%s3491_s6] sm:$0xff]   ;;  %v2437_v5 = vld [vmem:[%s3491_s6 + $0x8] sm:$0xff]   ;;  %v802_v8 = vlaneseq }
  0xff   : > { %2757 = vsyncadd (%p3575_p13), [#allocation15], 4294967264  ;;  %2204 = vmatprep.subr.bf16.mxu1 %v2793_v3  ;;  %2234 = vmatprep.subr.bf16.mxu0 %v2793_v3  ;;  %vm2794_vm1 = vmmov 0   ;;  %v783_v14 = vld [vmem:[%s672_s26] sm:$0x1]  ;;  %v2439_v27 = vld [vmem:[%s3492_s7 + $0x8] sm:$0xff]  }
 0x100   : > { %s779_s13 = scalar_select %p778_p1, %s2776_s21, 1  ;;  %2205 = vmatpush3.bf16.msra.mxu1 %v2436_v4  ;;  %2208 = vmatprep.mubr.msk.bf16.mxu1 %vm2794_vm1, %v2793_v3  ;;  %v3235_v12 = vshrl.u32 %v802_v8, 7  ;;  %v800_v15 = vadd.f32 1.0, %v783_v14  ;;  %v2160_v20 = vld [vmem:[%s680_s3] ss:$0 sm:$0xff]  ;;  %v2441_v31 = vld [vmem:[%s3490_s5 + $0x8] sm:$0xff]  }
 0x101   : > { %2206 = vmatprep.subr.bf16.mxu1 %v2793_v3  ;;  %2236 = vmatprep.mubr.msk.bf16.mxu0 %vm2794_vm1, %v2793_v3  ;;  %v2438_v24 = vld [vmem:[%s3492_s7] sm:$0xff]   ;;  %v2103_v33 = vld [vmem:[#allocation13] ss:$0 sm:$0xff]  ;;  %vm947_vm2 = vcmask 60416   ;;  %s2795_s29 = smov 104   ;;  %s2796_s24 = smov 120  }
 0x102   : > { %s2102_s19 = sshll.u32 %s779_s13, 3  ;;  %v804_v16 = vsub.s32 0, %v3235_v12  ;;  %v2440_v29 = vld [vmem:[%s3490_s5] sm:$0xff]   ;;  %v2107_v40 = vld [vmem:[#allocation14] ss:$0 sm:$0xff]  ;;  %vm1083_vm3 = vcmask 64512  }
 0x103   : > { %v2113_v49 = vld [vmem:[%s3493_s8] ss:$0 sm:$0xff]  ;;  %vm1146_vm4 = vcmask 1043456   ;;  %s2798_s14 = smov 8   ;;  %s2799_s10 = smov 16   ;;  %vm1311_vm5 = vcmask 126016  }
 0x104   : > { %s781_s0 = scalar_lea.vmem %s3576_s25, %s2102_s19  ;;  %2207 = vmatpush3.bf16.msra.mxu1 %v2437_v5  ;;  %v805_v17 = vrot.slane %v800_v15, %v804_v16  ;;  %s2797_s25 = smov 112   ;;  %vm1430_vm6 = vcmask 191616   ;;  %vm1549_vm7 = vcmask 257216  }
 0x105   : > { %v3216_v0 = vld [vmem:[%s781_s0] sm:$0xff]  ;;  %2212 = vmatprep.subr.bf16.mxu1 %v2793_v3  ;;  %s2800_s17 = smov 24   ;;  %s3577_s13 = sld [smem:[#allocation37_spill]] }
 0x106   : > { %v790_v1 = vmul.f32 %v3216_v0, %v3216_v0  ;;  %s3579_s27 = sld [smem:[#allocation41_spill]]  ;;  %s3580_s18 = sld [smem:[#allocation40_spill]] }
 0x107   : > { %s2101_s3 = sshll.u32 %s3183_s16, 3  ;;  %s2152_s0 = sshll.u32 %s2776_s21, 7 }
 0x108   : > { %v792_v2 = vsel %vm791_vm0, %v790_v1, 0.0  ;;  %s777_s2 = scalar_lea.vmem [#allocation17], %s2101_s3  ;;  %s3584_s20 = sld [smem:[#allocation43_spill]] }
 0x109   : > { %793 = vadd.xlane.f32.xlu0 %v792_v2  ;;  %s1897_s21 = scalar_lea.sflag [#allocation7], %s3183_s16 }
 0x10c   : > { %v2448_v12 = vld [vmem:[%s3579_s27] sm:$0xff]  }
 0x10d   : > { %992 = vadd.xlane.f32.xlu0 %v792_v2 }
 0x196   : > { %v794_v6 = vpop.xlane.xlu0 %793 }
 0x197   : > { %v796_v7 = vmul.f32 0.03125, %v794_v6 }
 0x199   : > { %v797_v9 = vadd.f32 1e-06, %v796_v7 }
 0x19a   : > { %v993_v10 = vpop.xlane.xlu0 %992 }
 0x19b   : > { %2456 = vrsqrt.f32 %v797_v9  ;;  %v995_v11 = vmul.f32 0.03125, %v993_v10 }
 0x19d   : > { %v996_v13 = vadd.f32 1e-06, %v995_v11 }
 0x19f   : > { %2458 = vrsqrt.f32 %v996_v13 }
 0x1a5   : > { %v2457_v18 = vpop.eup %2456 }
 0x1a6   : > { %v799_v19 = vmul.f32 %v2457_v18, %v3216_v0 }
 0x1a8   : > { %v807_v21 = vmul.f32 %v805_v17, %v799_v19 }
 0x1a9   : > { %v2459_v23 = vpop.eup %2458 }
 0x1aa   : > { %v814_v22 = vadd.f32 %v2160_v20, %v807_v21  ;;  %v998_v26 = vmul.f32 %v2459_v23, %v3216_v0 }
 0x1ac   : > { %v815_v25 = vpack.c.bf16 %v814_v22, %v814_v22  ;;  %v1006_v28 = vmul.f32 %v998_v26, %v805_v17 }
 0x1ae   : > { %2209 = vmatmul.mubr.msk.bf16.vlgmr.msra.gmra.mrb[0].mxu1 %vm791_vm0, %v815_v25  ;;  %v1013_v30 = vadd.f32 %v2160_v20, %v1006_v28 }
 0x1af   : > { %2213 = vmatpush3.bf16.msra.mxu1 %v2438_v24  ;;  %2216 = vmatprep.mubr.msk.bf16.mxu1 %vm2794_vm1, %v2793_v3 }
 0x1b0   : > { %2214 = vmatprep.subr.bf16.mxu1 %v2793_v3  ;;  %v1014_v32 = vpack.c.bf16 %v1013_v30, %v1013_v30 }
 0x1b3   : > { %2215 = vmatpush3.bf16.msra.mxu1 %v2439_v27 }
 0x1b4   : > { %2220 = vmatprep.subr.bf16.mxu1 %v2793_v3 }
 0x1b6   : > { %2217 = vmatmul.mubr.msk.bf16.vlgmr.msra.gmra.mrb[4].mxu1 %vm791_vm0, %v815_v25 }
 0x1b7   : > { %2221 = vmatpush3.bf16.msra.mxu1 %v2440_v29  ;;  %2224 = vmatprep.mubr.msk.bf16.mxu1 %vm2794_vm1, %v2793_v3 }
 0x1b8   : > { %2222 = vmatprep.subr.bf16.mxu1 %v2793_v3 }
 0x1bb   : > { %2223 = vmatpush3.bf16.msra.mxu1 %v2441_v31 }
 0x1bc   : > { %2228 = vmatprep.subr.bf16.mxu1 %v2793_v3 }
 0x1be   : > { %2225 = vmatmul.mubr.msk.bf16.vlgmr.msra.gmra.mrb[8].mxu1 %vm791_vm0, %v1014_v32 }
 0x1bf   : > { %2230 = vmatprep.mubr.msk.bf16.mxu1 %vm2794_vm1, %v2793_v3 }
 0x281   : > { %v876_v34 = vpop.f32.mrb[0].mxu1 }
 0x282   : > { %v877_v35 = vadd.f32 %v2103_v33, %v876_v34  ;;  %v2210_v36 = vpop.f32.mrb[1].mxu1 }
 0x283   : > { %v879_v37 = vpop.f32.mrb[2].mxu1 }
 0x284   : > { %v882_v38 = vpack.c.bf16 %v877_v35, %v877_v35  ;;  %v2211_v39 = vpop.f32.mrb[3].mxu1 }
 0x286   : > { %948 = vst.msk [vmem:[#allocation2] sm:$0xf] %vm947_vm2, %v882_v38  ;;  %976 = vrot.lane.b32.xlu0 %v882_v38, %s2795_s29  ;;  %953 = vrot.lane.b32.xlu1 %v882_v38, %s2796_s24 }
 0x289   : > { %v940_v41 = vpop.f32.mrb[4].mxu1 }
 0x28a   : > { %v941_v42 = vadd.f32 %v2107_v40, %v940_v41  ;;  %966 = vrot.lane.b32.xlu1 %v882_v38, %s2797_s25  ;;  %v2218_v43 = vpop.f32.mrb[5].mxu1 }
 0x28b   : > { %v943_v44 = vpop.f32.mrb[6].mxu1 }
 0x28c   : > { %v3275_v45 = vpack.c.bf16 %v941_v42, %v941_v42  ;;  %v2219_v46 = vpop.f32.mrb[7].mxu1 }
 0x28d   : > { %v1082_v47 = vld [vmem:[#allocation2] sm:$0xf] }
 0x28e   : > { %949 = vst.msk [vmem:[#allocation3] sm:$0xf] %vm947_vm2, %v3275_v45  ;;  %v1088_v48 = vsel %vm1083_vm3, %v1082_v47, 0 }
 0x28f   : > { %2229 = vmatpush3.bf16.xpose.msra.mxu1 %v1088_v48 }
 0x290   : > { %2240 = vmatprep.subr.bf16.mxu1 %v2793_v3 }
 0x291   : > { %v1075_v50 = vpop.f32.mrb[8].mxu1 }
 0x292   : > { %v1076_v51 = vadd.f32 %v2113_v49, %v1075_v50  ;;  %v2226_v52 = vpop.f32.mrb[9].mxu1 }
 0x293   : > { %v1078_v53 = vpop.f32.mrb[10].mxu1 }
 0x294   : > { %v1081_v54 = vpack.c.bf16 %v1076_v51, %v1076_v51  ;;  %v2227_v55 = vpop.f32.mrb[11].mxu1 }
 0x295   : > { %v1142_v56 = vld [vmem:[#allocation3] sm:$0xf] }
 0x296   : > { %1196 = vrot.lane.b32.xlu1 %v1081_v54, %s2796_s24  ;;  %2231 = vmatmul.mubr.msk.bf16.vlgmr.msra.gmra.mrb[12].mxu1 %vm1083_vm3, %v1081_v54  ;;  %v1148_v57 = vsel %vm1146_vm4, %v1142_v56, 0 }
 0x297   : > { %2235 = vmatpush3.bf16.msra.mxu0 %v1148_v57  ;;  %2242 = vmatprep.mubr.msk.bf16.mxu1 %vm2794_vm1, %v2793_v3 }
 0x298   : > { %2246 = vmatprep.subr.bf16.mxu0 %v2793_v3 }
 0x29a   : > { %1315 = vrot.lane.b32.xlu1 %v1081_v54, %s2797_s25 }
 0x29e   : > { %1434 = vrot.lane.b32.xlu1 %v1081_v54, %s2795_s29 }
 0x2f8   : > { %v977_v58 = vpop.permute.xlu0 %976  ;;  %v954_v59 = vpop.permute.xlu1 %953 }
 0x2f9   : > { %980 = vst.msk [vmem:[#allocation2 + $0xc] sm:$0xf] %vm947_vm2, %v977_v58  ;;  %957 = vst.msk [vmem:[#allocation2 + $0x4] sm:$0xf] %vm947_vm2, %v954_v59 }
 0x2fc   : > { %v967_v60 = vpop.permute.xlu1 %966 }
 0x2fd   : > { %970 = vst.msk [vmem:[#allocation2 + $0x8] sm:$0xf] %vm947_vm2, %v967_v60 }
 0x300   : > { %v1194_v61 = vld [vmem:[#allocation2 + $0x4] sm:$0xf]  ;;  %v1433_v4 = vld [vmem:[#allocation2 + $0xc] sm:$0xf] }
 0x301   : > { %v1202_v62 = vsel %vm1083_vm3, %v1194_v61, 0  ;;  %v1440_v6 = vsel %vm1083_vm3, %v1433_v4, 0 }
 0x302   : > { %2241 = vmatpush3.bf16.xpose.msra.mxu1 %v1202_v62 }
 0x303   : > { %2252 = vmatprep.subr.bf16.mxu1 %v2793_v3 }
 0x304   : > { %v1314_v63 = vld [vmem:[#allocation2 + $0x8] sm:$0xf] }
 0x305   : > { %v1321_v2 = vsel %vm1083_vm3, %v1314_v63, 0 }
 0x308   : > { %v1197_v1 = vpop.permute.xlu1 %1196 }
 0x309   : > { %2243 = vmatmul.mubr.msk.bf16.vlgmr.msra.gmra.mrb[16].mxu1 %vm1083_vm3, %v1197_v1 }
 0x30a   : > { %2253 = vmatpush3.bf16.xpose.msra.mxu1 %v1321_v2  ;;  %2254 = vmatprep.mubr.msk.bf16.mxu1 %vm2794_vm1, %v2793_v3 }
 0x30b   : > { %2264 = vmatprep.subr.bf16.mxu1 %v2793_v3 }
 0x30c   : > { %v1316_v5 = vpop.permute.xlu1 %1315 }
 0x310   : > { %v1435_v7 = vpop.permute.xlu1 %1434 }
 0x311   : > { %2255 = vmatmul.mubr.msk.bf16.vlgmr.msra.gmra.mrb[20].mxu1 %vm1083_vm3, %v1316_v5 }
 0x312   : > { %2265 = vmatpush3.bf16.xpose.msra.mxu1 %v1440_v6  ;;  %2266 = vmatprep.mubr.msk.bf16.mxu1 %vm2794_vm1, %v2793_v3 }
 0x313   : > { %2276 = vmatprep.subr.bf16.mxu1 %v2793_v3 }
 0x319   : > { %2267 = vmatmul.mubr.msk.bf16.vlgmr.msra.gmra.mrb[24].mxu1 %vm1083_vm3, %v1435_v7 }
 0x31a   : > { %2280 = vmatprep.mubr.msk.bf16.mxu1 %vm2794_vm1, %v2793_v3 }
 0x369   : > { %v1124_v8 = vpop.f32.mrb[12].mxu1 }
 0x36a   : > { %v2232_v9 = vpop.f32.mrb[13].mxu1  ;;  %v1130_v10 = vsel %vm1083_vm3, %v1124_v8, -inf }
 0x36b   : > { %1131 = vmax.xlane.f32.xlu1 %v1130_v10  ;;  %v1127_v11 = vpop.f32.mrb[14].mxu1 }
 0x36c   : > { %v2233_v13 = vpop.f32.mrb[15].mxu1 }
 0x3dc   : > { %v1238_v14 = vpop.f32.mrb[16].mxu1 }
 0x3dd   : > { %v2244_v15 = vpop.f32.mrb[17].mxu1  ;;  %v1244_v17 = vsel %vm1083_vm3, %v1238_v14, -inf }
 0x3de   : > { %1245 = vmax.xlane.f32.xlu0 %v1244_v17  ;;  %v1241_v18 = vpop.f32.mrb[18].mxu1 }
 0x3df   : > { %v2245_v19 = vpop.f32.mrb[19].mxu1 }
 0x3e4   : > { %v1357_v20 = vpop.f32.mrb[20].mxu1 }
 0x3e5   : > { %v2256_v21 = vpop.f32.mrb[21].mxu1  ;;  %v1363_v22 = vsel %vm1083_vm3, %v1357_v20, -inf }
 0x3e6   : > { %1364 = vmax.xlane.f32.xlu1 %v1363_v22  ;;  %v1360_v23 = vpop.f32.mrb[22].mxu1 }
 0x3e7   : > { %v2257_v24 = vpop.f32.mrb[23].mxu1 }
 0x3ec   : > { %v1476_v25 = vpop.f32.mrb[24].mxu1 }
 0x3ed   : > { %v2268_v26 = vpop.f32.mrb[25].mxu1  ;;  %v1482_v27 = vsel %vm1083_vm3, %v1476_v25, -inf }
 0x3ee   : > { %1483 = vmax.xlane.f32.xlu1 %v1482_v27  ;;  %v1479_v28 = vpop.f32.mrb[26].mxu1 }
 0x3ef   : > { %v2269_v29 = vpop.f32.mrb[27].mxu1 }
 0x3f8   : > { %v1132_v30 = vpop.xlane.xlu1 %1131 }
 0x3f9   : > { %v1133_v31 = vsub.f32 %v1124_v8, %v1132_v30  ;;  %v2442_v30 = vld [vmem:[%s3496_s11] sm:$0xff]  }
 0x3fa   : > { %2277 = vmatpush3.bf16.msra.mxu1 %v2442_v30 }
 0x3fb   : > { %v1134_v32 = vmul.f32 1.442695, %v1133_v31  ;;  %v2443_v31 = vld [vmem:[%s3496_s11 + $0x8] sm:$0xff]   ;;  %2278 = vmatprep.subr.bf16.mxu1 %v2793_v3 }
 0x3fd   : > { %2460 = vpow2.f32 %v1134_v32 }
 0x3fe   : > { %2279 = vmatpush3.bf16.msra.mxu1 %v2443_v31 }
 0x3ff   : > { %2292 = vmatprep.subr.bf16.mxu1 %v2793_v3 }
 0x407   : > { %v2461_v33 = vpop.eup %2460 }
 0x408   : > { %v1136_v34 = vsel %vm1083_vm3, %v2461_v33, 0.0 }
 0x409   : > { %1137 = vadd.xlane.f32.xlu0 %v1136_v34 }
 0x46b   : > { %v1246_v35 = vpop.xlane.xlu0 %1245 }
 0x46c   : > { %v1247_v36 = vsub.f32 %v1238_v14, %v1246_v35 }
 0x46e   : > { %v1248_v37 = vmul.f32 1.442695, %v1247_v36 }
 0x470   : > { %2462 = vpow2.f32 %v1248_v37 }
 0x473   : > { %v1365_v38 = vpop.xlane.xlu1 %1364 }
 0x474   : > { %v1366_v39 = vsub.f32 %v1357_v20, %v1365_v38 }
 0x476   : > { %v1367_v40 = vmul.f32 1.442695, %v1366_v39 }
 0x478   : > { %2464 = vpow2.f32 %v1367_v40 }
 0x47a   : > { %v2463_v41 = vpop.eup %2462 }
 0x47b   : > { %v1250_v42 = vsel %vm1083_vm3, %v2463_v41, 0.0  ;;  %v1484_v47 = vpop.xlane.xlu1 %1483 }
 0x47c   : > { %1251 = vadd.xlane.f32.xlu1 %v1250_v42  ;;  %v1485_v48 = vsub.f32 %v1476_v25, %v1484_v47 }
 0x47e   : > { %v1486_v49 = vmul.f32 1.442695, %v1485_v48 }
 0x482   : > { %v2465_v43 = vpop.eup %2464 }
 0x483   : > { %v1369_v44 = vsel %vm1083_vm3, %v2465_v43, 0.0 }
 0x484   : > { %1370 = vadd.xlane.f32.xlu0 %v1369_v44 }
 0x48d   : > { %971 = vrot.lane.b32.xlu1 %v3275_v45, %s2797_s25  ;;  %s3583_s25 = sld [smem:[#allocation29_spill]] }
 0x493   : > { %p3586_p4 = scmp.ne.s32.totalorder %s3583_s25, 0 }
 0x496   : > { %v1138_v46 = vpop.xlane.xlu0 %1137 }
 0x497   : > { %2466 = vrcp.f32 %v1138_v46 }
 0x498   : > { %2468 = vpow2.f32 %v1486_v49 }
 0x49a   : > { %961 = vrot.lane.b32.xlu0 %v3275_v45, %s2796_s24  ;;  %s3578_s24 = sld [smem:[#allocation39_spill]] }
 0x4a1   : > { %v2467_v50 = vpop.eup %2466 }
 0x4a2   : > { %v1140_v51 = vmul.f32 %v2467_v50, %v2461_v33  ;;  %v2469_v53 = vpop.eup %2468 }
 0x4a3   : > { %v1488_v54 = vsel %vm1083_vm3, %v2469_v53, 0.0 }
 0x4a4   : > { %v1141_v52 = vpack.c.bf16 %v1140_v51, %v1140_v51  ;;  %v2444_v51 = vld [vmem:[%s3577_s13] sm:$0xff]  }
 0x4a6   : > { %2237 = vmatmul.mubr.msk.bf16.vlgmr.msra.gmra.mrb[0].mxu0 %vm1083_vm3, %v1141_v52  ;;  %v2445_v52 = vld [vmem:[%s3578_s24] sm:$0xff]  }
 0x4a7   : > { %2248 = vmatprep.mubr.msk.bf16.mxu0 %vm2794_vm1, %v2793_v3 }
 0x4b1   : > { %1489 = vadd.xlane.f32.xlu1 %v1488_v54 }
 0x4c2   : > { %981 = vrot.lane.b32.xlu1 %v3275_v45, %s2795_s29  ;;  %s3582_s29 = sld [smem:[#allocation42_spill]] }
 0x509   : > { %v1252_v55 = vpop.xlane.xlu1 %1251 }
 0x50a   : > { %2470 = vrcp.f32 %v1252_v55 }
 0x50d   : > { %v972_v56 = vpop.permute.xlu1 %971 }
 0x50e   : > { %975 = vst.msk [vmem:[#allocation3 + $0x8] sm:$0xf] %vm947_vm2, %v972_v56 }
 0x511   : > { %v1371_v57 = vpop.xlane.xlu0 %1370 }
 0x512   : > { %2472 = vrcp.f32 %v1371_v57  ;;  %v1619_v57 = vld [vmem:[%s688_s23] sm:$0x1] }
 0x514   : > { %v2471_v59 = vpop.eup %2470 }
 0x515   : > { %v962_v58 = vpop.permute.xlu0 %961  ;;  %v1254_v60 = vmul.f32 %v2471_v59, %v2463_v41  ;;  %v1376_v63 = vld [vmem:[#allocation3 + $0x8] sm:$0xf]  ;;  %v2128_v41 = vld [vmem:[#allocation16] ss:$0 sm:$0xff] }
 0x516   : > { %965 = vst.msk [vmem:[#allocation3 + $0x4] sm:$0xf] %vm947_vm2, %v962_v58  ;;  %v1381_v2 = vsel %vm1146_vm4, %v1376_v63, 0  ;;  %v1629_v58 = vadd.f32 1.0, %v1619_v57 }
 0x517   : > { %v1255_v1 = vpack.c.bf16 %v1254_v60, %v1254_v60 }
 0x518   : > { %v1634_v59 = vrot.slane %v1629_v58, %v804_v16  ;;  %v2449_v16 = vld [vmem:[%s3579_s27 + $0x8] sm:$0xff]  }
 0x51c   : > { %v2473_v45 = vpop.eup %2472 }
 0x51d   : > { %v1257_v61 = vld [vmem:[#allocation3 + $0x4] sm:$0xf]  ;;  %v1373_v4 = vmul.f32 %v2473_v45, %v2465_v43 }
 0x51e   : > { %v1262_v62 = vsel %vm1146_vm4, %v1257_v61, 0 }
 0x51f   : > { %2247 = vmatpush3.bf16.msra.mxu0 %v1262_v62  ;;  %v1374_v5 = vpack.c.bf16 %v1373_v4, %v1373_v4  ;;  %v2132_v62 = vld [vmem:[%s696_s1] ss:$0 sm:$0xff]  ;;  %v2451_v4 = vld [vmem:[%s3579_s27 + $0x18] sm:$0xff]   ;;  %s3435_s1 = scalar_lea.hbm %s3584_s20, %s2152_s0 }
 0x520   : > { %2258 = vmatprep.subr.bf16.mxu0 %v2793_v3 }
 0x522   : > { %2249 = vmatmul.mubr.msk.bf16.vlgmr.msra.gmra.mrb[4].mxu0 %vm1083_vm3, %v1255_v1 }
 0x523   : > { %2259 = vmatpush3.bf16.msra.mxu0 %v1381_v2  ;;  %2260 = vmatprep.mubr.msk.bf16.mxu0 %vm2794_vm1, %v2793_v3  ;;  %v2450_v2 = vld [vmem:[%s3579_s27 + $0x10] sm:$0xff]  }
 0x524   : > { %2270 = vmatprep.subr.bf16.mxu0 %v2793_v3 }
 0x52a   : > { %2261 = vmatmul.mubr.msk.bf16.vlgmr.msra.gmra.mrb[8].mxu0 %vm1083_vm3, %v1374_v5  ;;  %v2452_v5 = vld [vmem:[%s3579_s27 + $0x20] sm:$0xff]  }
 0x52b   : > { %2272 = vmatprep.mubr.msk.bf16.mxu0 %vm2794_vm1, %v2793_v3 }
 0x53e   : > { %v1490_v6 = vpop.xlane.xlu1 %1489 }
 0x53f   : > { %2474 = vrcp.f32 %v1490_v6  ;;  %v2453_v6 = vld [vmem:[%s3579_s27 + $0x28] sm:$0xff]  }
 0x542   : > { %v982_v7 = vpop.permute.xlu1 %981 }
 0x543   : > { %985 = vst.msk [vmem:[#allocation3 + $0xc] sm:$0xf] %vm947_vm2, %v982_v7  ;;  %v2454_v7 = vld [vmem:[%s3579_s27 + $0x30] sm:$0xff]  }
 0x549   : > { %v2475_v8 = vpop.eup %2474 }
 0x54a   : > { %v1492_v9 = vmul.f32 %v2475_v8, %v2469_v53  ;;  %v1495_v10 = vld [vmem:[#allocation3 + $0xc] sm:$0xf]  ;;  %v2447_v53 = vld [vmem:[%s3578_s24 + $0x8] sm:$0xff]  }
 0x54b   : > { %v1500_v11 = vsel %vm1146_vm4, %v1495_v10, 0  ;;  %v2455_v8 = vld [vmem:[%s3579_s27 + $0x38] sm:$0xff]  }
 0x54c   : > { %2271 = vmatpush3.bf16.msra.mxu0 %v1500_v11  ;;  %v1493_v13 = vpack.c.bf16 %v1492_v9, %v1492_v9  ;;  %v2137_v9 = vld [vmem:[%s3580_s18] ss:$0 sm:$0xff]  ;;  %s3585_s18 = smov %s3584_s20 }
 0x54d   : > { %2284 = vmatprep.subr.bf16.mxu0 %v2793_v3 }
 0x54f   : > { %2273 = vmatmul.mubr.msk.bf16.vlgmr.msra.gmra.mrb[12].mxu0 %vm1083_vm3, %v1493_v13 }
 0x550   : > { %2288 = vmatprep.mubr.msk.bf16.mxu0 %vm2794_vm1, %v2793_v3  ;;  %2285 = vmatpush3.bf16.msra.mxu0 %v2444_v51 }
 0x551   : > { %2286 = vmatprep.subr.bf16.mxu0 %v2793_v3 }
 0x579   : > { %v1184_v14 = vpop.f32.mrb[0].mxu0 }
 0x57a   : > { %v1190_v15 = vpack.c.bf16 %v1184_v14, %v1184_v14  ;;  %v2238_v17 = vpop.f32.mrb[1].mxu0 }
 0x57b   : > { %v1187_v18 = vpop.f32.mrb[2].mxu0 }
 0x57c   : > { %1192 = vst.msk [vmem:[#allocation4] sm:$0xf] %vm947_vm2, %v1190_v15  ;;  %v2239_v19 = vpop.f32.mrb[3].mxu0 }
 0x5f5   : > { %v1298_v20 = vpop.f32.mrb[4].mxu0 }
 0x5f6   : > { %v2157_v21 = vpack.c.bf16 %v1298_v20, %v1298_v20  ;;  %v2250_v22 = vpop.f32.mrb[5].mxu0 }
 0x5f7   : > { %v1301_v23 = vpop.f32.mrb[6].mxu0 }
 0x5f8   : > { %1308 = vrot.lane.b32.xlu0 %v2157_v21, %s2798_s14  ;;  %v2251_v24 = vpop.f32.mrb[7].mxu0  ;;  %s1911_s14 = sshll.u32 %s777_s2, 4  ;;  %s3437_s14 = int_to_ptr.vmem [resolvable:$true] %s1911_s14 }
 0x5f9   : > { %s2686_s26 = scalar_lea.vmem %s3437_s14, 128 }
 0x5fa   : > { %p2687_p8 = scmp.ne.s32.totalorder %s3437_s14, %s2686_s26 }
 0x5fc   : > { %p2688_p0 = pnand %p2687_p8, %p3586_p4 }
 0x5fd   : > { %v1417_v25 = vpop.f32.mrb[8].mxu0 }
 0x5fe   : > { %v2158_v26 = vpack.c.bf16 %v1417_v25, %v1417_v25  ;;  %v2262_v27 = vpop.f32.mrb[9].mxu0  ;;  %p2689_p9 = pneg %p2688_p0 }
 0x5ff   : > { %v1420_v28 = vpop.f32.mrb[10].mxu0 }
 0x600   : > { %1427 = vrot.lane.b32.xlu1 %v2158_v26, %s2799_s10  ;;  %v2263_v29 = vpop.f32.mrb[11].mxu0 }
 0x601   : > { %v2142_v29 = vld [vmem:[%s3582_s29] ss:$0 sm:$0xff] }
 0x622   : > { %v1536_v32 = vpop.f32.mrb[12].mxu0 }
 0x623   : > { %v2159_v33 = vpack.c.bf16 %v1536_v32, %v1536_v32  ;;  %v2274_v34 = vpop.f32.mrb[13].mxu0 }
 0x624   : > { %v1539_v35 = vpop.f32.mrb[14].mxu0 }
 0x625   : > { %1546 = vrot.lane.b32.xlu0 %v2159_v33, %s2800_s17  ;;  %v2275_v36 = vpop.f32.mrb[15].mxu0  ;;  %s3581_s17 = sld [smem:[#allocation38_spill]] }
 0x62b   : > { %v2133_v23 = vld [vmem:[%s3581_s17] ss:$0 sm:$0xff]  ;;  %s2801_s17 = smov [#allocation17]  }
 0x62c   : > { %s2690_s3 = sshll.u32 %s2801_s17, 4  ;;  %s2691_s3 = int_to_ptr.vmem [resolvable:$false] %s2690_s3 }
 0x62d   : > { %s2692_s15 = scalar_lea.vmem %s2691_s3, 256  ;;  %p2693_p6 = scmp.lt.s32.totalorder %s3437_s14, %s2691_s3 }
 0x62e   : > { %p2694_p2 = scmp.lt.s32.totalorder %s2692_s15, %s2686_s26 }
 0x630   : > { %p2695_p12 = por %p2694_p2, %p2693_p6 }
 0x632   : > { %p2696_p10 = pnand %p2695_p12, %p2689_p9 }
 0x66a   : > { %v1309_v37 = vpop.permute.xlu0 %1308 }
 0x66b   : > { %1312 = vst.msk [vmem:[#allocation4] sm:$0xf] %vm1311_vm5, %v1309_v37 }
 0x672   : > { %v1428_v38 = vpop.permute.xlu1 %1427 }
 0x673   : > { %1431 = vst.msk [vmem:[#allocation4] sm:$0xf] %vm1430_vm6, %v1428_v38 }
 0x697   : > { %v1547_v39 = vpop.permute.xlu0 %1546 }
 0x698   : > { %1550 = vst.msk [vmem:[#allocation4] sm:$0xf] %vm1549_vm7, %v1547_v39 }
 0x69f   : > { %v1551_v40 = vld [vmem:[#allocation4] sm:$0xf] }
 0x6a0   : > { %2281 = vmatmul.mubr.msk.bf16.vlgmr.msra.gmra.mrb[28].mxu1 %vm791_vm0, %v1551_v40 }
 0x6a1   : > { %2296 = vmatprep.mubr.msk.bf16.mxu1 %vm2794_vm1, %v2793_v3  ;;  %2293 = vmatpush3.bf16.msra.mxu1 %v2445_v52 }
 0x6a2   : > { %2294 = vmatprep.subr.bf16.mxu1 %v2793_v3 }
 0x6a5   : > { %2295 = vmatpush3.bf16.msra.mxu1 %v2447_v53 }
 0x773   : > { %v1612_v42 = vpop.f32.mrb[28].mxu1 }
 0x774   : > { %v1613_v43 = vadd.f32 %v2128_v41, %v1612_v42  ;;  %v2282_v44 = vpop.f32.mrb[29].mxu1 }
 0x775   : > { %v1615_v46 = vpop.f32.mrb[30].mxu1 }
 0x776   : > { %v3358_v47 = vadd.f32 %v1613_v43, %v3216_v0  ;;  %v2283_v48 = vpop.f32.mrb[31].mxu1  ;;  %v2446_v0 = vld [vmem:[%s3577_s13 + $0x8] sm:$0xff]  }
 0x777   : > { %2287 = vmatpush3.bf16.msra.mxu0 %v2446_v0 }
 0x778   : > { %v1621_v49 = vmul.f32 %v3358_v47, %v3358_v47  ;;  %2300 = vmatprep.subr.bf16.mxu0 %v2793_v3 }
 0x77a   : > { %v1622_v50 = vsel %vm791_vm0, %v1621_v49, 0.0 }
 0x77b   : > { %1623 = vadd.xlane.f32.xlu1 %v1622_v50 }
 0x808   : > { %v1624_v54 = vpop.xlane.xlu1 %1623 }
 0x809   : > { %v1625_v55 = vmul.f32 0.03125, %v1624_v54 }
 0x80b   : > { %v1626_v56 = vadd.f32 1e-06, %v1625_v55 }
 0x80d   : > { %2476 = vrsqrt.f32 %v1626_v56 }
 0x817   : > { %v2477_v60 = vpop.eup %2476 }
 0x818   : > { %v1628_v61 = vmul.f32 %v2477_v60, %v3358_v47 }
 0x81a   : > { %v1636_v63 = vmul.f32 %v1634_v59, %v1628_v61 }
 0x81c   : > { %v1643_v1 = vadd.f32 %v2132_v62, %v1636_v63 }
 0x81e   : > { %v1644_v45 = vpack.c.bf16 %v1643_v1, %v1643_v1 }
 0x820   : > { %2289 = vmatmul.mubr.msk.bf16.vlgmr.msra.gmra.mrb[16].mxu0 %vm791_vm0, %v1644_v45  ;;  %2297 = vmatmul.mubr.msk.bf16.vlgmr.msra.gmra.mrb[32].mxu1 %vm791_vm0, %v1644_v45 }
 0x821   : > { %2316 = vmatprep.mubr.msk.bf16.mxu0 %vm2794_vm1, %v2793_v3  ;;  %2301 = vmatpush3.bf16.msra.mxu0 %v2448_v12 }
 0x822   : > { %2302 = vmatprep.subr.bf16.mxu0 %v2793_v3 }
 0x825   : > { %2303 = vmatpush3.bf16.msra.mxu0 %v2449_v16 }
 0x826   : > { %2304 = vmatprep.subr.bf16.mxu0 %v2793_v3 }
 0x829   : > { %2305 = vmatpush3.bf16.msra.mxu0 %v2450_v2 }
 0x82a   : > { %2306 = vmatprep.subr.bf16.mxu0 %v2793_v3 }
 0x82d   : > { %2307 = vmatpush3.bf16.msra.mxu0 %v2451_v4 }
 0x82e   : > { %2308 = vmatprep.subr.bf16.mxu0 %v2793_v3 }
 0x831   : > { %2309 = vmatpush3.bf16.msra.mxu0 %v2452_v5 }
 0x832   : > { %2310 = vmatprep.subr.bf16.mxu0 %v2793_v3 }
 0x835   : > { %2311 = vmatpush3.bf16.msra.mxu0 %v2453_v6 }
 0x836   : > { %2312 = vmatprep.subr.bf16.mxu0 %v2793_v3 }
 0x839   : > { %2313 = vmatpush3.bf16.msra.mxu0 %v2454_v7 }
 0x83a   : > { %2314 = vmatprep.subr.bf16.mxu0 %v2793_v3 }
 0x83d   : > { %2315 = vmatpush3.bf16.msra.mxu0 %v2455_v8 }
 0x8f3   : > { %v1705_v10 = vpop.f32.mrb[16].mxu0  ;;  %v1768_v11 = vpop.f32.mrb[32].mxu1 }
 0x8f4   : > { %v1769_v13 = vadd.f32 %v2137_v9, %v1768_v11  ;;  %v2290_v14 = vpop.f32.mrb[17].mxu0  ;;  %v2298_v15 = vpop.f32.mrb[33].mxu1  ;;  %v1706_v25 = vadd.f32 %v2133_v23, %v1705_v10 }
 0x8f5   : > { %v1708_v17 = vpop.f32.mrb[18].mxu0  ;;  %v1771_v18 = vpop.f32.mrb[34].mxu1 }
 0x8f6   : > { %v2141_v19 = vmul.f32 -1.442695, %v1769_v13  ;;  %v2291_v20 = vpop.f32.mrb[19].mxu0  ;;  %v2299_v3 = vpop.f32.mrb[35].mxu1 }
 0x8f8   : > { %2478 = vpow2.f32 %v2141_v19 }
 0x902   : > { %v2479_v21 = vpop.eup %2478 }
 0x903   : > { %v1777_v22 = vadd.f32 1.0, %v2479_v21 }
 0x905   : > { %2480 = vrcp.f32 %v1777_v22 }
 0x90f   : > { %v2481_v24 = vpop.eup %2480 }
 0x910   : > { %v1780_v26 = vmul.f32 %v2481_v24, %v1769_v13 }
 0x912   : > { %v1781_v27 = vmul.f32 %v1780_v26, %v1706_v25 }
 0x914   : > { %v1782_v28 = vpack.c.bf16 %v1781_v27, %v1781_v27 }
 0x916   : > { %2317 = vmatmul.mubr.bf16.vlgmr.msra.gmra.mrb[20].mxu0 %v1782_v28 }
 0x9e9   : > { %v1888_v30 = vpop.f32.mrb[20].mxu0 }
 0x9ea   : > { %v1889_v31 = vadd.f32 %v2142_v29, %v1888_v30  ;;  %v2318_v32 = vpop.f32.mrb[21].mxu0 }
 0x9eb   : > { %v1891_v33 = vpop.f32.mrb[22].mxu0 }
 0x9ec   : > { %v1894_v34 = vadd.f32 %v1889_v31, %v3358_v47  ;;  %v2319_v35 = vpop.f32.mrb[23].mxu0 }
 0x9ee   : > { %1895 = vst.msk [vmem:[%s777_s2] sm:$0xff] %vm791_vm0, %v1894_v34 }
 0x9ef   : > { %2699 = shalt.err (!%p2696_p10)
}
 0x9f0   : > { %s2700_s16 = scalar_lea.hbm %s3435_s1, 128  ;;  %s2704_s0 = scalar_lea.hbm %s3585_s18, 256 }
 0x9f1   : > { %p2701_p7 = scmp.ne.s32.totalorder %s3435_s1, %s2700_s16  ;;  %p2705_p3 = scmp.lt.u32.totalorder %s3435_s1, %s3585_s18 }
 0x9f2   : > { %p2706_p13 = scmp.lt.u32.totalorder %s2704_s0, %s2700_s16  ;;  %p2708_p8 = scmp.lt.u32.totalorder %s2700_s16, %s3435_s1 }
 0x9f3   : > { %p2702_p5 = pnand %p2701_p7, %p3586_p4 }
 0x9f4   : > { %p2707_p1 = por %p2706_p13, %p2705_p3 }
 0x9f5   : > { %p2703_p11 = pneg %p2702_p5 }
 0x9f6   : > { %p2709_p0 = por %p2708_p8, %p2707_p1 }
 0x9f8   : > { %p2710_p9 = pnand %p2709_p0, %p2703_p11 }
 0x9fa   : > { %2713 = shalt.err (!%p2710_p9)
}
 0x9fb   : > { %2340 = dma.vmem_to_hbm [thread:$0]  (%p3586_p4), %s3437_s14, 128, %s3435_s1, %s1897_s21  }
 0x9fc PF: > { %s3587_s10 = sld [smem:[#allocation24_spill]]  ;;  %s3588_s20 = sld [smem:[#allocation27_spill]] }
 0x9fd   : > { %p3590_p2 = scmp.ge.s32.totalorder %s2784_s22, 2 }
 0xa02   : > { %s1923_s26 = sand.u32 1, %s3587_s10   ;;  %p3589_p6 = scmp.ne.s32.totalorder %s3588_s20, 0 }
 0xa03   : > { %s1924_s17 = scalar_lea.sflag [#allocation7], %s1923_s26 }
 0xa04   : > { %p2366_p12 = pnand %p3590_p2, %p3589_p6 }
 0xa06   : > { %2759 = dma.done.wait (!%p2366_p12), %s1924_s17, 128  }
 0xa07   : > { %2761 = vsyncadd (!%p2366_p12), %s1924_s17, 4294967168  ;;  %s42_s22 = sadd.s32 1, %s2784_s22   ;;  %s3591_s3 = sld [smem:[#allocation25_spill]] }
 0xa08   : > { %p39_p10 = scmp.ge.s32.totalorder %s42_s22, 4   ;;  %s3592_s20 = sld [smem:[#allocation30_spill]] }
 0xa09   : > { %s3593_s21 = sld [smem:[#allocation26_spill]]  ;;  %s3594_s1 = sld [smem:[#allocation28_spill]] }
 0xa0a   : > { %s3595_s0 = smov %s2768_s30  ;;  %41 = sbr.rel (!%p39_p10) target bundleno = 25 (0x19), region = 210 }
 0xa0d   : > { %s3596_s30 = smov %s3591_s3 }
 0xa11   :  { %1929 = vsyncpa [#allocation6], 1 }
 0xa12   :  { %1931 = vsyncpa [#allocation6 + $0x1], 1 }
 0xa13   :  { %1932 = vsyncpa [#allocation9], 1 }
 0xa14   :  { %1934 = vsyncpa [#allocation9 + $0x1], 1 }
 0xa15   :  { %1935 = vsyncpa [#allocation12], 1 }
 0xa16   :  { %1937 = vsyncpa [#allocation12 + $0x1], 1 }
 0xa17   :  { %1938 = vsyncpa [#allocation15], 1 }
 0xa18   :  { %1939 = vsyncpa [#allocation7], 1 }
 0xa19   :  { %1941 = vsyncpa [#allocation7 + $0x1], 1 }

</bundles_post_ra>
